<compile_context>
chip_gen: v7x
topology: tpu7x:2x2x1
jax: 0.10.0
libtpu: 0.0.40
codegen_flags: <defaults>
</compile_context>

<pallas_src>
import math

import jax
import jax.numpy as jnp
from jax.experimental import pallas as pl
from jax.experimental.pallas import tpu as pltpu

LN_EPS = 1e-5  # PyTorch nn.LayerNorm default eps


# ----------------------------- in-kernel helpers -----------------------------

def _erf(x):
    # Abramowitz & Stegun 7.1.26 (max abs err ~1.5e-7, i.e. float32-level).
    # TODO(synk): replace with jax.lax.erf if/when an erf Mosaic lowering is guaranteed.
    a1, a2, a3, a4, a5 = 0.254829592, -0.284496736, 1.421413741, -1.453152027, 1.061405429
    p = 0.3275911
    ax = jnp.abs(x)
    t = 1.0 / (1.0 + p * ax)
    poly = ((((a5 * t + a4) * t + a3) * t + a2) * t + a1) * t
    y = 1.0 - poly * jnp.exp(-ax * ax)
    return jnp.where(x >= 0, y, -y)


def _gelu_exact(x):
    # PyTorch nn.GELU() default is the exact (erf-based) GELU.
    return 0.5 * x * (1.0 + _erf(x * (1.0 / math.sqrt(2.0))))


# --------------------------------- kernel ------------------------------------

def ffn_kernel(x_ref, g_ref, b_ref, w1_ref, b1_ref, w2_ref, b2_ref,
               o_ref, xn_ref, acc_ref):
    """Fused LayerNorm -> Linear1 -> GELU -> Linear2 over one row tile.

    grid = (row_tiles, hidden_tiles); the hidden axis is a reduction:
      j == 0     : compute LayerNorm once into VMEM scratch, zero the accumulator
      every j    : acc += gelu(xn @ w1[:, j]) @ w2[j, :]
      j == last  : write acc + b2 to the output tile
    """
    j = pl.program_id(1)

    @pl.when(j == 0)
    def _():
        x = x_ref[...].astype(jnp.float32)                 # (TS, D)
        mu = jnp.mean(x, axis=-1, keepdims=True)
        var = jnp.mean((x - mu) ** 2, axis=-1, keepdims=True)   # biased, like torch
        xn = (x - mu) * jax.lax.rsqrt(var + LN_EPS)
        xn = xn * g_ref[...].astype(jnp.float32) + b_ref[...].astype(jnp.float32)
        xn_ref[...] = xn.astype(xn_ref.dtype)              # compute dtype (bf16 or f32)
        acc_ref[...] = jnp.zeros_like(acc_ref)

    # Linear1 (MXU, fp32 accumulate) + bias + exact GELU, on this hidden tile.
    h = jnp.dot(xn_ref[...], w1_ref[...],
                preferred_element_type=jnp.float32) + b1_ref[...].astype(jnp.float32)
    h = _gelu_exact(h)                                     # (TS, TH) fp32

    # Linear2 partial product for this hidden tile, accumulated in fp32.
    acc_ref[...] += jnp.dot(h.astype(w2_ref.dtype), w2_ref[...],
                            preferred_element_type=jnp.float32)

    @pl.when(j == pl.num_programs(1) - 1)
    def _():
        o_ref[...] = (acc_ref[...] + b2_ref[...].astype(jnp.float32)).astype(o_ref.dtype)


# ------------------------------ pallas_call glue -------------------------------

def _round_up(x, m):
    return (x + m - 1) // m * m


def feedforward_pallas(x, params, *, block_rows=256, block_hidden=512):
    """x: (..., D) float32.  params: dict from init_ffn_params (weights may be bf16)."""
    orig_shape = x.shape
    D = orig_shape[-1]
    N = math.prod(orig_shape[:-1])
    xf = x.reshape(N, D)

    g, b = params["ln_g"], params["ln_b"]
    w1, b1 = params["w1"], params["b1"]          # (D, Hd), (1, Hd)  -- pre-transposed
    w2, b2 = params["w2"], params["b2"]          # (Hd, D), (1, D)
    Hd = w1.shape[1]

    # Tile sizes: rows multiple of 8, hidden multiple of 128 (lane granularity).
    TS = min(_round_up(block_rows, 8), _round_up(N, 8))
    TH = min(_round_up(block_hidden, 128), _round_up(Hd, 128))
    N_pad = _round_up(N, TS)
    Hd_pad = _round_up(Hd, TH)

    if N_pad != N:
        xf = jnp.pad(xf, ((0, N_pad - N), (0, 0)))
    if Hd_pad != Hd:
        # zero-padded hidden columns contribute gelu(0)=0 through zero w2 rows.
        w1 = jnp.pad(w1, ((0, 0), (0, Hd_pad - Hd)))
        b1 = jnp.pad(b1, ((0, 0), (0, Hd_pad - Hd)))
        w2 = jnp.pad(w2, ((0, Hd_pad - Hd), (0, 0)))

    grid = (N_pad // TS, Hd_pad // TH)
    compute_dtype = w1.dtype                      # bf16 or f32 MXU path

    out = pl.pallas_call(
        ffn_kernel,
        out_shape=jax.ShapeDtypeStruct((N_pad, D), x.dtype),
        grid_spec=pltpu.PrefetchScalarGridSpec(
            num_scalar_prefetch=0,
            grid=grid,
            in_specs=[
                pl.BlockSpec((TS, D), lambda i, j: (i, 0)),   # x rows (re-used across j)
                pl.BlockSpec((1, D), lambda i, j: (0, 0)),    # ln gamma
                pl.BlockSpec((1, D), lambda i, j: (0, 0)),    # ln beta
                pl.BlockSpec((D, TH), lambda i, j: (0, j)),   # w1 hidden tile
                pl.BlockSpec((1, TH), lambda i, j: (0, j)),   # b1 hidden tile
                pl.BlockSpec((TH, D), lambda i, j: (j, 0)),   # w2 hidden tile
                pl.BlockSpec((1, D), lambda i, j: (0, 0)),    # b2
            ],
            out_specs=pl.BlockSpec((TS, D), lambda i, j: (i, 0)),
            scratch_shapes=[
                pltpu.VMEM((TS, D), compute_dtype),   # post-LayerNorm activations
                pltpu.VMEM((TS, D), jnp.float32),     # fp32 output accumulator
            ],
        ),
        compiler_params=pltpu.CompilerParams(
            dimension_semantics=("parallel", "arbitrary")),
    )(xf, g, b, w1, b1, w2, b2)

    return out[:N].reshape(orig_shape)


# --------------------------------- params ---------------------------------------

def init_ffn_params(key, dim, hidden_dim, weight_dtype=jnp.float32):
    """Weights stored pre-transposed (in, out) so the kernel computes x @ W directly."""
    k1, k2, k3, k4 = jax.random.split(key, 4)
    w1 = jax.random.normal(k1, (hidden_dim, dim), jnp.float32) * 0.08   # torch (out, in)
    w2 = jax.random.normal(k3, (dim, hidden_dim), jnp.float32) * 0.08
    return {
        "ln_g": jnp.ones((1, dim), jnp.float32),
        "ln_b": jnp.zeros((1, dim), jnp.float32),
        "w1": w1.T.astype(weight_dtype),                                # (dim, hidden)
        "b1": jax.random.normal(k2, (1, hidden_dim), jnp.float32) * 0.02,
        "w2": w2.T.astype(weight_dtype),                                # (hidden, dim)
        "b2": jax.random.normal(k4, (1, dim), jnp.float32) * 0.02,
    }


# Pure-JAX fp32 reference mirroring the PyTorch module.
def feedforward_ref(x, params):
    from jax.scipy.special import erf
    g, b = params["ln_g"], params["ln_b"]
    w1, b1 = params["w1"].astype(jnp.float32), params["b1"]
    w2, b2 = params["w2"].astype(jnp.float32), params["b2"]
    mu = jnp.mean(x, axis=-1, keepdims=True)
    var = jnp.mean((x - mu) ** 2, axis=-1, keepdims=True)
    xn = (x - mu) / jnp.sqrt(var + LN_EPS) * g + b
    h = xn @ w1 + b1
    h = 0.5 * h * (1.0 + erf(h / jnp.sqrt(2.0)))     # exact GELU
    return h @ w2 + b2


if __name__ == "__main__":
    B, S, D, HIDDEN = 2, 128, 128, 256

    key = jax.random.PRNGKey(0)
    kx, kp = jax.random.split(key)
    x = jax.random.normal(kx, (B, S, D), jnp.float32)
    params = init_ffn_params(kp, D, HIDDEN, weight_dtype=jnp.float32)

    ref = feedforward_ref(x, params)

    # f32 weights: tight correctness check (small tiles to exercise both grid axes).
    out_f32 = jax.block_until_ready(
        feedforward_pallas(x, params, block_rows=128, block_hidden=128))
    assert out_f32.shape == x.shape
    err32 = float(jnp.max(jnp.abs(out_f32 - ref)))
    assert jnp.allclose(out_f32, ref, atol=2e-4, rtol=2e-4), f"f32 max abs err = {err32}"

    # bf16 weights / native MXU bf16 matmuls with fp32 accumulation (fast path).
    params_bf16 = dict(params,
                       w1=params["w1"].astype(jnp.bfloat16),
                       w2=params["w2"].astype(jnp.bfloat16))
    out_bf16 = jax.block_until_ready(
        feedforward_pallas(x, params_bf16, block_rows=128, block_hidden=128))
    errbf = float(jnp.max(jnp.abs(out_bf16 - ref)))
    assert jnp.allclose(out_bf16, ref, atol=6e-2, rtol=6e-2), f"bf16 max abs err = {errbf}"

    print("KERNEL_OK")
</pallas_src>

<mosaic_0001>
module attributes {stable_mosaic.version = 11 : i64} {
  func.func @ffn_kernel(%arg0: i32, %arg1: i32, %arg2: memref<128x128xf32, #tpu.memory_space<vmem>>, %arg3: memref<1x128xf32, #tpu.memory_space<vmem>>, %arg4: memref<1x128xf32, #tpu.memory_space<vmem>>, %arg5: memref<128x128xf32, #tpu.memory_space<vmem>>, %arg6: memref<1x128xf32, #tpu.memory_space<vmem>>, %arg7: memref<128x128xf32, #tpu.memory_space<vmem>>, %arg8: memref<1x128xf32, #tpu.memory_space<vmem>>, %arg9: memref<128x128xf32, #tpu.memory_space<vmem>>, %arg10: memref<128x128xf32, #tpu.memory_space<vmem>>, %arg11: memref<128x128xf32, #tpu.memory_space<vmem>>) attributes {dimension_semantics = [#tpu.dimension_semantics<parallel>, #tpu.dimension_semantics<arbitrary>], iteration_bounds = array<i64: 2, 2>, scalar_prefetch = 0 : i64, scratch_operands = 2 : i64, tpu.core_type = #tpu.core_type<tc>, window_params = [{transform_indices = @transform_0, window_bounds = array<i64: 128, 128>}, {pipeline_mode = #tpu.pipeline_mode<synchronous>, transform_indices = @transform_1, window_bounds = array<i64: 1, 128>}, {pipeline_mode = #tpu.pipeline_mode<synchronous>, transform_indices = @transform_2, window_bounds = array<i64: 1, 128>}, {transform_indices = @transform_3, window_bounds = array<i64: 128, 128>}, {transform_indices = @transform_4, window_bounds = array<i64: 1, 128>}, {transform_indices = @transform_5, window_bounds = array<i64: 128, 128>}, {pipeline_mode = #tpu.pipeline_mode<synchronous>, transform_indices = @transform_6, window_bounds = array<i64: 1, 128>}, {transform_indices = @transform_7, window_bounds = array<i64: 128, 128>}]} {
    %c0_i32 = arith.constant 0 : i32
    %0 = arith.cmpi eq, %arg1, %c0_i32 : i32
    %1 = arith.extui %0 : i1 to i32
    %c0_i32_0 = arith.constant 0 : i32
    %2 = arith.cmpi ne, %1, %c0_i32_0 : i32
    scf.if %2 {
      %c0_29 = arith.constant 0 : index
      %c0_30 = arith.constant 0 : index
      %57 = vector.load %arg2[%c0_29, %c0_30] : memref<128x128xf32, #tpu.memory_space<vmem>>, vector<128x128xf32>
      %cst_31 = arith.constant dense<0.000000e+00> : vector<128xf32>
      %58 = vector.multi_reduction <add>, %57, %cst_31 [1] : vector<128x128xf32> to vector<128xf32>
      %59 = vector.shape_cast %58 : vector<128xf32> to vector<128x1xf32>
      %cst_32 = arith.constant 1.280000e+02 : f32
      %60 = vector.broadcast %cst_32 : f32 to vector<128x1xf32>
      %61 = arith.divf %59, %60 : vector<128x1xf32>
      %62 = vector.broadcast %61 : vector<128x1xf32> to vector<128x128xf32>
      %63 = arith.subf %57, %62 : vector<128x128xf32>
      %64 = arith.mulf %63, %63 : vector<128x128xf32>
      %cst_33 = arith.constant dense<0.000000e+00> : vector<128xf32>
      %65 = vector.multi_reduction <add>, %64, %cst_33 [1] : vector<128x128xf32> to vector<128xf32>
      %66 = vector.shape_cast %65 : vector<128xf32> to vector<128x1xf32>
      %cst_34 = arith.constant 1.280000e+02 : f32
      %67 = vector.broadcast %cst_34 : f32 to vector<128x1xf32>
      %68 = arith.divf %66, %67 : vector<128x1xf32>
      %69 = vector.broadcast %61 : vector<128x1xf32> to vector<128x128xf32>
      %70 = arith.subf %57, %69 : vector<128x128xf32>
      %cst_35 = arith.constant 9.99999974E-6 : f32
      %71 = vector.broadcast %cst_35 : f32 to vector<128x1xf32>
      %72 = arith.addf %68, %71 : vector<128x1xf32>
      %73 = math.rsqrt %72 : vector<128x1xf32>
      %74 = vector.broadcast %73 : vector<128x1xf32> to vector<128x128xf32>
      %75 = arith.mulf %70, %74 : vector<128x128xf32>
      %c0_36 = arith.constant 0 : index
      %c0_37 = arith.constant 0 : index
      %76 = vector.load %arg3[%c0_36, %c0_37] : memref<1x128xf32, #tpu.memory_space<vmem>>, vector<1x128xf32>
      %77 = vector.broadcast %76 : vector<1x128xf32> to vector<128x128xf32>
      %78 = arith.mulf %75, %77 : vector<128x128xf32>
      %c0_38 = arith.constant 0 : index
      %c0_39 = arith.constant 0 : index
      %79 = vector.load %arg4[%c0_38, %c0_39] : memref<1x128xf32, #tpu.memory_space<vmem>>, vector<1x128xf32>
      %80 = vector.broadcast %79 : vector<1x128xf32> to vector<128x128xf32>
      %81 = arith.addf %78, %80 : vector<128x128xf32>
      %c0_40 = arith.constant 0 : index
      %c0_41 = arith.constant 0 : index
      %82 = vector.load %arg10[%c0_40, %c0_41] : memref<128x128xf32, #tpu.memory_space<vmem>>, vector<128x128xf32>
      tpu.vector_store %arg10[%c0_40, %c0_41], %81 {strides = array<i32>} : memref<128x128xf32, #tpu.memory_space<vmem>>, vector<128x128xf32>,
      %cst_42 = arith.constant 0.000000e+00 : f32
      %83 = vector.broadcast %cst_42 : f32 to vector<128x128xf32>
      %c0_43 = arith.constant 0 : index
      %c0_44 = arith.constant 0 : index
      %84 = vector.load %arg11[%c0_43, %c0_44] : memref<128x128xf32, #tpu.memory_space<vmem>>, vector<128x128xf32>
      tpu.vector_store %arg11[%c0_43, %c0_44], %83 {strides = array<i32>} : memref<128x128xf32, #tpu.memory_space<vmem>>, vector<128x128xf32>,
    } else {
    }
    %c0 = arith.constant 0 : index
    %c0_1 = arith.constant 0 : index
    %3 = vector.load %arg10[%c0, %c0_1] : memref<128x128xf32, #tpu.memory_space<vmem>>, vector<128x128xf32>
    %c0_2 = arith.constant 0 : index
    %c0_3 = arith.constant 0 : index
    %4 = vector.load %arg5[%c0_2, %c0_3] : memref<128x128xf32, #tpu.memory_space<vmem>>, vector<128x128xf32>
    %cst = arith.constant dense<0.000000e+00> : vector<128x128xf32>
    %5 = tpu.matmul %3, %4, %cst {dimension_numbers = #tpu.dot_dimension_numbers<[1], [0], [0], [1], [0, 0, 1, 1], [], []>} : vector<128x128xf32>, vector<128x128xf32>, vector<128x128xf32> -> vector<128x128xf32>
    %c0_4 = arith.constant 0 : index
    %c0_5 = arith.constant 0 : index
    %6 = vector.load %arg6[%c0_4, %c0_5] : memref<1x128xf32, #tpu.memory_space<vmem>>, vector<1x128xf32>
    %7 = vector.broadcast %6 : vector<1x128xf32> to vector<128x128xf32>
    %8 = arith.addf %5, %7 : vector<128x128xf32>
    %cst_6 = arith.constant 5.000000e-01 : f32
    %9 = vector.broadcast %cst_6 : f32 to vector<128x128xf32>
    %10 = arith.mulf %9, %8 : vector<128x128xf32>
    %cst_7 = arith.constant 0.707106769 : f32
    %11 = vector.broadcast %cst_7 : f32 to vector<128x128xf32>
    %12 = arith.mulf %8, %11 : vector<128x128xf32>
    %13 = math.absf %12 : vector<128x128xf32>
    %cst_8 = arith.constant 0.327591091 : f32
    %14 = vector.broadcast %cst_8 : f32 to vector<128x128xf32>
    %15 = arith.mulf %14, %13 : vector<128x128xf32>
    %cst_9 = arith.constant 1.000000e+00 : f32
    %16 = vector.broadcast %cst_9 : f32 to vector<128x128xf32>
    %17 = arith.addf %16, %15 : vector<128x128xf32>
    %cst_10 = arith.constant 1.000000e+00 : f32
    %18 = vector.broadcast %cst_10 : f32 to vector<128x128xf32>
    %19 = arith.divf %18, %17 : vector<128x128xf32>
    %cst_11 = arith.constant 1.06140542 : f32
    %20 = vector.broadcast %cst_11 : f32 to vector<128x128xf32>
    %21 = arith.mulf %20, %19 : vector<128x128xf32>
    %cst_12 = arith.constant -1.45315206 : f32
    %22 = vector.broadcast %cst_12 : f32 to vector<128x128xf32>
    %23 = arith.addf %21, %22 : vector<128x128xf32>
    %24 = arith.mulf %23, %19 : vector<128x128xf32>
    %cst_13 = arith.constant 1.42141378 : f32
    %25 = vector.broadcast %cst_13 : f32 to vector<128x128xf32>
    %26 = arith.addf %24, %25 : vector<128x128xf32>
    %27 = arith.mulf %26, %19 : vector<128x128xf32>
    %cst_14 = arith.constant -0.284496725 : f32
    %28 = vector.broadcast %cst_14 : f32 to vector<128x128xf32>
    %29 = arith.addf %27, %28 : vector<128x128xf32>
    %30 = arith.mulf %29, %19 : vector<128x128xf32>
    %cst_15 = arith.constant 0.254829586 : f32
    %31 = vector.broadcast %cst_15 : f32 to vector<128x128xf32>
    %32 = arith.addf %30, %31 : vector<128x128xf32>
    %33 = arith.mulf %32, %19 : vector<128x128xf32>
    %cst_16 = arith.constant 0.000000e+00 : f32
    %34 = vector.broadcast %cst_16 : f32 to vector<128x128xf32>
    %35 = arith.subf %34, %13 : vector<128x128xf32>
    %36 = arith.mulf %35, %13 : vector<128x128xf32>
    %37 = math.exp %36 : vector<128x128xf32>
    %38 = arith.mulf %33, %37 : vector<128x128xf32>
    %cst_17 = arith.constant 1.000000e+00 : f32
    %39 = vector.broadcast %cst_17 : f32 to vector<128x128xf32>
    %40 = arith.subf %39, %38 : vector<128x128xf32>
    %cst_18 = arith.constant 0.000000e+00 : f32
    %41 = vector.broadcast %cst_18 : f32 to vector<128x128xf32>
    %42 = arith.cmpf oge, %12, %41 : vector<128x128xf32>
    %cst_19 = arith.constant 0.000000e+00 : f32
    %43 = vector.broadcast %cst_19 : f32 to vector<128x128xf32>
    %44 = arith.subf %43, %40 : vector<128x128xf32>
    %45 = arith.select %42, %40, %44 : vector<128x128xi1>, vector<128x128xf32>
    %cst_20 = arith.constant 1.000000e+00 : f32
    %46 = vector.broadcast %cst_20 : f32 to vector<128x128xf32>
    %47 = arith.addf %46, %45 : vector<128x128xf32>
    %48 = arith.mulf %10, %47 : vector<128x128xf32>
    %c0_21 = arith.constant 0 : index
    %c0_22 = arith.constant 0 : index
    %49 = vector.load %arg11[%c0_21, %c0_22] : memref<128x128xf32, #tpu.memory_space<vmem>>, vector<128x128xf32>
    %c0_23 = arith.constant 0 : index
    %c0_24 = arith.constant 0 : index
    %50 = vector.load %arg7[%c0_23, %c0_24] : memref<128x128xf32, #tpu.memory_space<vmem>>, vector<128x128xf32>
    %cst_25 = arith.constant dense<0.000000e+00> : vector<128x128xf32>
    %51 = tpu.matmul %48, %50, %cst_25 {dimension_numbers = #tpu.dot_dimension_numbers<[1], [0], [0], [1], [0, 0, 1, 1], [], []>} : vector<128x128xf32>, vector<128x128xf32>, vector<128x128xf32> -> vector<128x128xf32>
    %52 = arith.addf %49, %51 : vector<128x128xf32>
    %c0_26 = arith.constant 0 : index
    %c0_27 = arith.constant 0 : index
    %53 = vector.load %arg11[%c0_26, %c0_27] : memref<128x128xf32, #tpu.memory_space<vmem>>, vector<128x128xf32>
    tpu.vector_store %arg11[%c0_26, %c0_27], %52 {strides = array<i32>} : memref<128x128xf32, #tpu.memory_space<vmem>>, vector<128x128xf32>,
    %c1_i32 = arith.constant 1 : i32
    %54 = arith.cmpi eq, %arg1, %c1_i32 : i32
    %55 = arith.extui %54 : i1 to i32
    %c0_i32_28 = arith.constant 0 : i32
    %56 = arith.cmpi ne, %55, %c0_i32_28 : i32
    scf.if %56 {
      %c0_29 = arith.constant 0 : index
      %c0_30 = arith.constant 0 : index
      %57 = vector.load %arg11[%c0_29, %c0_30] : memref<128x128xf32, #tpu.memory_space<vmem>>, vector<128x128xf32>
      %c0_31 = arith.constant 0 : index
      %c0_32 = arith.constant 0 : index
      %58 = vector.load %arg8[%c0_31, %c0_32] : memref<1x128xf32, #tpu.memory_space<vmem>>, vector<1x128xf32>
      %59 = vector.broadcast %58 : vector<1x128xf32> to vector<128x128xf32>
      %60 = arith.addf %57, %59 : vector<128x128xf32>
      %c0_33 = arith.constant 0 : index
      %c0_34 = arith.constant 0 : index
      %61 = vector.load %arg9[%c0_33, %c0_34] : memref<128x128xf32, #tpu.memory_space<vmem>>, vector<128x128xf32>
      tpu.vector_store %arg9[%c0_33, %c0_34], %60 {strides = array<i32>} : memref<128x128xf32, #tpu.memory_space<vmem>>, vector<128x128xf32>,
    } else {
    }
    return
  }
  func.func @transform_0(%arg0: i32, %arg1: i32) -> (i32, i32) {
    %c0_i32 = arith.constant 0 : i32
    %c0_i32_0 = arith.constant 0 : i32
    return %arg0, %c0_i32 : i32, i32
  }
  func.func @transform_1(%arg0: i32, %arg1: i32) -> (i32, i32) {
    %c0_i32 = arith.constant 0 : i32
    %c0_i32_0 = arith.constant 0 : i32
    %c0_i32_1 = arith.constant 0 : i32
    return %c0_i32, %c0_i32_0 : i32, i32
  }
  func.func @transform_2(%arg0: i32, %arg1: i32) -> (i32, i32) {
    %c0_i32 = arith.constant 0 : i32
    %c0_i32_0 = arith.constant 0 : i32
    %c0_i32_1 = arith.constant 0 : i32
    return %c0_i32, %c0_i32_0 : i32, i32
  }
  func.func @transform_3(%arg0: i32, %arg1: i32) -> (i32, i32) {
    %c0_i32 = arith.constant 0 : i32
    %c0_i32_0 = arith.constant 0 : i32
    return %c0_i32, %arg1 : i32, i32
  }
  func.func @transform_4(%arg0: i32, %arg1: i32) -> (i32, i32) {
    %c0_i32 = arith.constant 0 : i32
    %c0_i32_0 = arith.constant 0 : i32
    return %c0_i32, %arg1 : i32, i32
  }
  func.func @transform_5(%arg0: i32, %arg1: i32) -> (i32, i32) {
    %c0_i32 = arith.constant 0 : i32
    %c0_i32_0 = arith.constant 0 : i32
    return %arg1, %c0_i32 : i32, i32
  }
  func.func @transform_6(%arg0: i32, %arg1: i32) -> (i32, i32) {
    %c0_i32 = arith.constant 0 : i32
    %c0_i32_0 = arith.constant 0 : i32
    %c0_i32_1 = arith.constant 0 : i32
    return %c0_i32, %c0_i32_0 : i32, i32
  }
  func.func @transform_7(%arg0: i32, %arg1: i32) -> (i32, i32) {
    %c0_i32 = arith.constant 0 : i32
    %c0_i32_0 = arith.constant 0 : i32
    return %arg0, %c0_i32 : i32, i32
  }
}

</mosaic_0001>

<bundles_post_ra>
// kernel: tpu_custom_call.1
= control target key start
LH: loop header
LB: loop body
LE: loop exit
PB: predicated region body
PF: predicated region fallthrough
CT: control target
= control target key end

     0   :  { %s3389_s0 = inlined_call_operand.hbm [shape: f32[256,128], index: 0, kind: input, shape index: {}]   ;;  %s3390_s1 = inlined_call_operand.vmem [shape: f32[1,128], index: 1, kind: input, shape index: {}]   ;;  %s3391_s2 = inlined_call_operand.vmem [shape: f32[1,128], index: 2, kind: input, shape index: {}]   ;;  %s3392_s3 = inlined_call_operand.hbm [shape: f32[128,256], index: 3, kind: input, shape index: {}]   ;;  %s3393_s4 = inlined_call_operand.vmem [shape: f32[1,256], index: 4, kind: input, shape index: {}]   ;;  %s3394_s5 = inlined_call_operand.hbm [shape: f32[256,128], index: 5, kind: input, shape index: {}]   ;;  %s3395_s6 = inlined_call_operand.vmem [shape: f32[1,128], index: 6, kind: input, shape index: {}]   ;;  %s3396_s7 = inlined_call_operand.hbm [shape: f32[256,128], index: 7, kind: output, shape index: {}]  }
   0x1   :  { %3422 = sst [smem:[#allocation41_spill]] %s3390_s1 }
   0x2   :  { %3423 = sst [smem:[#allocation42_spill]] %s3391_s2 }
   0x3   :  { %3424 = sst [smem:[#allocation43_spill]] %s3392_s3 }
   0x4   :  { %3425 = sst [smem:[#allocation44_spill]] %s3395_s6 }
   0x5   :  { %3426 = sst [smem:[#allocation45_spill]] %s3396_s7 }
   0x6   :  { %12 = vsyncpa [#allocation5], 0 }
   0x7   :  { %14 = vsyncpa [#allocation5 + $0x1], 0 }
   0x8   :  { %15 = vsyncpa [#allocation8], 0 }
   0x9   :  { %17 = vsyncpa [#allocation8 + $0x1], 0 }
   0xa   :  { %18 = vsyncpa [#allocation6], 0 }
   0xb   :  { %20 = vsyncpa [#allocation6 + $0x1], 0  ;;  %s2464_s24 = smov 0   ;;  %s2466_s25 = smov 0  }
   0xc   :  { %s2468_s26 = smov 0   ;;  %s2470_s27 = smov 0  }
   0xd   :  { %s2472_s28 = smov 0   ;;  %s2474_s29 = smov 0  }
   0xe   :  { %s2476_s30 = smov 0   ;;  %s2478_s8 = smov 0  }
   0xf   :  { %s2480_s9 = smov 0   ;;  %s2482_s10 = smov 0  }
  0x10   :  { %s2484_s11 = smov 0  }
  0x11 LB: > { %3427 = sst [smem:[#allocation14_spill]] %s2380_s26  ;;  %s35_s12 = sadd.s32 1, %s2404_s9  ;;  %s2412_s11 = sphi %s2484_s11, %s26_s11   ;;  %s2408_s10 = sphi %s2482_s10, %s3507_s10   ;;  %s2404_s9 = sphi %s2480_s9, %s3513_s9   ;;  %s2400_s8 = sphi %s2478_s8, %s3505_s8   ;;  %s2396_s30 = sphi %s2476_s30, %s3512_s30   ;;  %s2392_s29 = sphi %s2474_s29, %s3504_s29   ;;  %s2388_s28 = sphi %s2472_s28, %s3511_s28   ;;  %s2384_s27 = sphi %s2470_s27, %s3510_s27   ;;  %s2380_s26 = sphi %s2468_s26, %s3502_s26   ;;  %s2376_s25 = sphi %s2466_s25, %s3509_s25   ;;  %s2372_s24 = sphi %s2464_s24, %s3508_s24  }
  0x12   : > { %3428 = sst [smem:[#allocation15_spill]] %s2392_s29  ;;  %p3400_p0 = scmp.eq.s32.totalorder %s2412_s11, 0 }
  0x13   : > { %3429 = sst [smem:[#allocation16_spill]] %s2400_s8  ;;  %p2521_p1 = scmp.ge.s32.totalorder %s35_s12, 2 }
  0x14   : > { %3430 = sst [smem:[#allocation17_spill]] %s2408_s10  ;;  %s113_s14 = sadd.s32 1, %s2380_s26 }
  0x15   : > { %p120_p2 = scmp.ne.s32.totalorder %s2380_s26, %s2376_s25  ;;  %s3515_s12 = smov (%p2521_p1, %s35_s12), 0 }
  0x16   : > { %3432 = sst [smem:[#allocation18_spill]] %s3515_s12  ;;  %s110_s15 = ssub.s32 %s2404_s9, %s3515_s12 }
  0x17   : > { %p122_p4 = por %p120_p2, %p3400_p0  ;;  %p3399_p5 = scmp.lt.s32.totalorder %s2412_s11, 4 }
  0x18   : > { %p111_p6 = scmp.eq.s32.totalorder %s110_s15, 0  ;;  %s279_s16 = sand.u32 1, %s2412_s11  }
  0x19   : > { %s281_s18 = sand.u32 1, %s2380_s26   ;;  %s1719_s20 = sshll.u32 %s2404_s9, 7 }
  0x1a   : > { %s2541_s17 = scalar_select %p111_p6, %s2380_s26, %s113_s14  }
  0x1b   : > { %s2544_s19 = sshll.u32 %s281_s18, 7  ;;  %s3434_s3 = sld [smem:[#allocation43_spill]] }
  0x1c   : > { %3433 = sst [smem:[#allocation19_spill]] %s2541_s17  ;;  %s283_s12 = scalar_lea.vmem [#allocation7], %s2544_s19 }
  0x1d   : > { %s289_s7 = sshll.u32 %s283_s12, 4  ;;  %p2555_p7 = pnand %p3399_p5, %p122_p4  ;;  %s2559_s7 = int_to_ptr.vmem [resolvable:$true] %s289_s7 }
  0x1e   : > { %s2562_s15 = scalar_lea.sflag [#allocation8], %s279_s16 }
  0x1f   : > { %p3403_p10 = pneg %p2555_p7 }
  0x21   : > { %s2550_s23 = scalar_lea.hbm %s3434_s3, %s1719_s20  ;;  %s2201_s21 = scalar_lea.hbm %s3434_s3, 4096 }
  0x22   : > { %s2196_s18 = scalar_lea.hbm %s2550_s23, 2048  ;;  %p2202_p13 = scmp.lt.u32.totalorder %s2550_s23, %s3434_s3 }
  0x23   : > { %p2197_p9 = scmp.ne.s32.totalorder %s2550_s23, %s2196_s18  ;;  %p2203_p2 = scmp.lt.u32.totalorder %s2201_s21, %s2196_s18 }
  0x24   : > { %p2205_p6 = scmp.lt.u32.totalorder %s2196_s18, %s2550_s23 }
  0x25   : > { %p2199_p11 = pnand %p3403_p10, %p2197_p9  ;;  %p2204_p4 = por %p2203_p2, %p2202_p13 }
  0x27   : > { %p2200_p12 = pneg %p2199_p11  ;;  %p2206_p5 = por %p2205_p6, %p2204_p4 }
  0x29   : > { %p2207_p3 = pnand %p2206_p5, %p2200_p12 }
  0x2b   : > { %2210 = shalt.err (!%p2207_p3)
}
  0x2c   : > { %s2211_s16 = scalar_lea.vmem %s2559_s7, 2048  ;;  %s2414_s12 = smov [#allocation7]  }
  0x2d   : > { %p2212_p9 = scmp.ne.s32.totalorder %s2559_s7, %s2211_s16  ;;  %s2216_s20 = sshll.u32 %s2414_s12, 4  ;;  %s2217_s20 = int_to_ptr.vmem [resolvable:$false] %s2216_s20 }
  0x2e   : > { %s2218_s17 = scalar_lea.vmem %s2217_s20, 4096  ;;  %p2219_p8 = scmp.lt.s32.totalorder %s2559_s7, %s2217_s20 }
  0x2f   : > { %p2214_p11 = pnand %p2212_p9, %p3403_p10  ;;  %p2220_p13 = scmp.lt.s32.totalorder %s2218_s17, %s2211_s16 }
  0x31   : > { %p2215_p0 = pneg %p2214_p11  ;;  %p2221_p2 = por %p2220_p13, %p2219_p8 }
  0x33   : > { %p2222_p4 = pnand %p2221_p2, %p2215_p0 }
  0x35   : > { %2225 = shalt.err (!%p2222_p4)
}
  0x36   : > { %s2415_s18 = smov 256   ;;  %s3401_s21 = smov 128  }
  0x37   : > { %s3404_s22 = smov 8   ;;  %p324_p0 = scmp.lt.s32.totalorder %s2412_s11, 5 }
  0x38   : > { %1996 = dma.hbm_to_vmem [thread:$0]  (!%p2555_p7), %s2550_s23, 2048, %s2559_s7, %s2562_s15, %s2415_s18, %s3401_s21, %s3404_s22  }
  0x39   : > { %p3436_p3 = scmp.ge.s32.totalorder %s2412_s11, 1  ;;  %s2600_s12 = sadd.s32 4294967295, %s2412_s11  }
  0x3a   : > { %s1712_s20 = sadd.s32 4294967294, %s2412_s11   ;;  %s38_s17 = sadd.s32 1, %s2408_s10 }
  0x3b   : > { %p2595_p5 = pnand %p3436_p3, %p324_p0  ;;  %s45_s3 = sadd.s32 1, %s2392_s29 }
  0x3c   : > { %s3517_s17 = smov (!%p2521_p1, %s38_s17), %s2408_s10  ;;  %p52_p8 = scmp.ne.s32.totalorder %s2392_s29, %s2388_s28 }
  0x3d   : > { %s3437_s16 = scalar_select %p2595_p5, 1, 0 }
  0x3e   : > { %p58_p12 = scmp.ne.s32.totalorder %s2388_s28, %s2384_s27  ;;  %p40_p6 = scmp.ge.s32.totalorder %s3517_s17, 2 }
  0x3f   : > { %p59_p9 = scmp.eq.s32.totalorder %s2600_s12, 0  ;;  %p3438_p11 = scmp.eq.s32.totalorder %s2412_s11, 0 }
  0x40   : > { %p223_p2 = scmp.eq.s32.totalorder %s2600_s12, 3  ;;  %s3519_s17 = smov (%p40_p6, %s3517_s17), 0 }
  0x41   : > { %p2615_p13 = por %p3438_p11, %p52_p8  ;;  %3440 = sst [smem:[#allocation20_spill]] %s3519_s17 }
  0x42   : > { %p2625_p1 = por %p59_p9, %p58_p12  ;;  %p3442_p4 = scmp.ne.s32.totalorder %s2376_s25, %s2372_s24 }
  0x43   : > { %s42_s18 = ssub.s32 %s2408_s10, %s3519_s17  ;;  %p2638_p3 = por %p223_p2, %p52_p8 }
  0x44   : > { %s3441_s13 = scalar_select %p2625_p1, 1, 0 }
  0x45   : > { %p2632_p0 = por %p3442_p4, %p59_p9  ;;  %p43_p11 = scmp.eq.s32.totalorder %s42_s18, 0 }
  0x46   : > { %s3444_s21 = scalar_select %p2638_p3, 1, 0 }
  0x47   : > { %s3443_s23 = scalar_select %p2632_p0, 1, 0 }
  0x48   : > { %p229_p10 = scmp.eq.s32.totalorder %s1712_s20, 3  ;;  %s258_s22 = sand.u32 1, %s2392_s29  }
  0x49   : > { %s1739_s26 = sshll.u32 %s2408_s10, 11  ;;  %s1715_s24 = sshll.u32 %s258_s22, 7 }
  0x4a   : > { %s2645_s8 = scalar_select %p43_p11, %s2392_s29, %s45_s3  }
  0x4b   : > { %p2650_p6 = por %p229_p10, %p58_p12  ;;  %s2657_s17 = scalar_lea.hbm %s3389_s0, %s1739_s26 }
  0x4c   : > { %3445 = sst [smem:[#allocation21_spill]] %s2645_s8  ;;  %p3447_p8 = scmp.lt.s32.totalorder %s2412_s11, 4 }
  0x4d   : > { %s3446_s6 = scalar_select %p2650_p6, 1, 0 }
  0x4e   : > { %p2663_p9 = pnand %p3447_p8, %p2615_p13  ;;  %s262_s20 = scalar_lea.vmem [#allocation4], %s1715_s24 }
  0x4f   : > { %s269_s18 = sshll.u32 %s262_s20, 4  ;;  %s2669_s10 = scalar_lea.sflag [#allocation5], %s258_s22  ;;  %s2667_s18 = int_to_ptr.vmem [resolvable:$true] %s269_s18 }
  0x50   : > { %s2226_s1 = scalar_lea.hbm %s2657_s17, 2048  ;;  %p2228_p12 = pneg %p2663_p9 }
  0x51   : > { %p2227_p10 = scmp.ne.s32.totalorder %s2657_s17, %s2226_s1  ;;  %s2231_s7 = scalar_lea.hbm %s3389_s0, 4096 }
  0x52   : > { %p2232_p13 = scmp.lt.u32.totalorder %s2657_s17, %s3389_s0  ;;  %p2233_p11 = scmp.lt.u32.totalorder %s2231_s7, %s2226_s1 }
  0x53   : > { %p2229_p2 = pnand %p2228_p12, %p2227_p10  ;;  %p2235_p6 = scmp.lt.u32.totalorder %s2226_s1, %s2657_s17 }
  0x54   : > { %p2234_p8 = por %p2233_p11, %p2232_p13 }
  0x55   : > { %p2230_p4 = pneg %p2229_p2 }
  0x56   : > { %p2236_p3 = por %p2235_p6, %p2234_p8 }
  0x58   : > { %p2237_p0 = pnand %p2236_p3, %p2230_p4 }
  0x5a   : > { %2240 = shalt.err (!%p2237_p0)
}
  0x5b   : > { %s2241_s22 = scalar_lea.vmem %s2667_s18, 2048  ;;  %s2418_s24 = smov [#allocation4]  }
  0x5c   : > { %p2242_p10 = scmp.ne.s32.totalorder %s2667_s18, %s2241_s22  ;;  %s2246_s20 = sshll.u32 %s2418_s24, 4  ;;  %s2247_s20 = int_to_ptr.vmem [resolvable:$false] %s2246_s20 }
  0x5d   : > { %s2248_s29 = scalar_lea.vmem %s2247_s20, 4096  ;;  %p2249_p5 = scmp.lt.s32.totalorder %s2667_s18, %s2247_s20 }
  0x5e   : > { %p2244_p2 = pnand %p2242_p10, %p2228_p12  ;;  %p2250_p13 = scmp.lt.s32.totalorder %s2248_s29, %s2241_s22 }
  0x60   : > { %p2245_p1 = pneg %p2244_p2  ;;  %p2251_p11 = por %p2250_p13, %p2249_p5 }
  0x62   : > { %p2252_p6 = pnand %p2251_p11, %p2245_p1 }
  0x64   : > { %2255 = shalt.err (!%p2252_p6)
}
  0x65   : > { %s3449_s8 = smov 8   ;;  %s3450_s1 = smov 128  }
  0x66   : > { %1993 = dma.hbm_to_vmem [thread:$0]  (!%p2663_p9), %s2657_s17, 2048, %s2667_s18, %s2669_s10, %s3450_s1, %s3450_s1, %s3449_s8  }
  0x67   : > { %s1740_s2 = sshll.u32 %s2404_s9, 11  ;;  %s309_s26 = scalar_lea.vmem [#allocation9], %s2544_s19 }
  0x68   : > { %s316_s7 = sshll.u32 %s309_s26, 4  ;;  %s2705_s20 = scalar_lea.hbm %s3394_s5, %s1740_s2  ;;  %s2707_s7 = int_to_ptr.vmem [resolvable:$true] %s316_s7 }
  0x69   : > { %s2256_s3 = scalar_lea.hbm %s2705_s20, 2048  ;;  %p3451_p1 = pneg %p2555_p7 }
  0x6a   : > { %p2257_p5 = scmp.ne.s32.totalorder %s2705_s20, %s2256_s3  ;;  %s2261_s17 = scalar_lea.hbm %s3394_s5, 4096 }
  0x6b   : > { %p2262_p9 = scmp.lt.u32.totalorder %s2705_s20, %s3394_s5  ;;  %p2263_p12 = scmp.lt.u32.totalorder %s2261_s17, %s2256_s3 }
  0x6c   : > { %p2259_p0 = pnand %p2257_p5, %p3451_p1  ;;  %p2265_p8 = scmp.lt.u32.totalorder %s2256_s3, %s2705_s20 }
  0x6d   : > { %p2264_p4 = por %p2263_p12, %p2262_p9 }
  0x6e   : > { %p2260_p3 = pneg %p2259_p0 }
  0x6f   : > { %p2266_p10 = por %p2265_p8, %p2264_p4 }
  0x71   : > { %p2267_p2 = pnand %p2266_p10, %p2260_p3 }
  0x73   : > { %2270 = shalt.err (!%p2267_p2)
}
  0x74   : > { %s2271_s2 = scalar_lea.vmem %s2707_s7, 2048  ;;  %p3452_p11 = pmov %p3451_p1 }
  0x75   : > { %p2272_p13 = scmp.ne.s32.totalorder %s2707_s7, %s2271_s2  ;;  %s2419_s26 = smov [#allocation9]  }
  0x76   : > { %s2276_s24 = sshll.u32 %s2419_s26, 4  ;;  %s2277_s24 = int_to_ptr.vmem [resolvable:$false] %s2276_s24 }
  0x77   : > { %p2274_p6 = pnand %p2272_p13, %p3452_p11  ;;  %s2278_s22 = scalar_lea.vmem %s2277_s24, 4096 }
  0x78   : > { %p2279_p1 = scmp.lt.s32.totalorder %s2707_s7, %s2277_s24  ;;  %p2280_p0 = scmp.lt.s32.totalorder %s2278_s22, %s2271_s2 }
  0x79   : > { %p2275_p5 = pneg %p2274_p6 }
  0x7a   : > { %p2281_p9 = por %p2280_p0, %p2279_p1 }
  0x7c   : > { %p2282_p12 = pnand %p2281_p9, %p2275_p5 }
  0x7e   : > { %2285 = shalt.err (!%p2282_p12)
}
  0x7f   : > { %1999 = dma.hbm_to_vmem [thread:$0]  (!%p2555_p7), %s2705_s20, 2048, %s2707_s7, %s2562_s15, %s3450_s1, %s3450_s1, %s3449_s8  }
  0x80   : > { %p3453_p3 = scmp.ne.s32.totalorder %s3437_s16, 0 }
  0x82   : > { %328 = sbr.rel (%p3453_p3) target bundleno = 1114 (0x45a), region = 48 }
  0x89   : > { %s2739_s3 = sand.u32 1, %s2388_s28   ;;  %p3454_p4 = scmp.ne.s32.totalorder %s3441_s13, 0 }
  0x8a   : > { %s1724_s10 = sshll.u32 %s2739_s3, 7  ;;  %s331_s19 = scalar_lea.sflag [#allocation5], %s2739_s3 }
  0x8b   : > { %s2743_s17 = scalar_lea.vmem [#allocation4], %s1724_s10 }
  0x8c   : > { %2359 = dma.done.wait (%p3454_p4), %s331_s19, 2048  }
  0x8d   : > { %2361 = vsyncadd (%p3454_p4), %s331_s19, 4294965248  ;;  %s339_s14 = sand.u32 1, %s2600_s12   ;;  %s341_s15 = sand.u32 1, %s2376_s25  }
  0x8e   : > { %s1725_s16 = sshll.u32 %s341_s15, 7  ;;  %s340_s8 = scalar_lea.sflag [#allocation8], %s339_s14 }
  0x8f   : > { %s2751_s1 = scalar_lea.vmem [#allocation7], %s1725_s16  ;;  %p3455_p7 = scmp.ne.s32.totalorder %s3443_s23, 0 }
  0x91   : > { %2363 = dma.done.wait (%p3455_p7), %s340_s8, 4096  }
  0x92   : > { %2365 = vsyncadd (%p3455_p7), %s340_s8, 4294963200  ;;  %p397_p8 = scmp.lt.s32.totalorder %s2396_s30, 1  ;;  %s2765_s18 = scalar_lea.vmem [#allocation9], %s1725_s16 }
  0x93   : > { %s2767_s29 = scalar_lea.vmem [#allocation10], %s1724_s10  ;;  %p1728_p10 = scmp.ne.s32.totalorder %s2396_s30, 0 }
  0x94   : > { %s2759_s7 = scalar_select %p397_p8, %s2396_s30, 1 }
  0x95   : > { %405 = sbr.rel (%p1728_p10) target bundleno = 494 (0x1ee), region = 64  ;;  %v406_v0 = vld [vmem:[%s2743_s17] sm:$0xff] (!%p1728_p10)  ;;  %v408_v1 = vld [vmem:[%s2743_s17 + $0x10] sm:$0xff] (!%p1728_p10)  ;;  %v407_v2 = vld [vmem:[%s2743_s17 + $0x8] sm:$0xff] (!%p1728_p10)  ;;  %s3456_s26 = sld [smem:[#allocation41_spill]] (!%p1728_p10) }
  0x96   : > { %s399_s12 = scalar_lea.vmem %s3393_s4, %s2759_s7  ;;  %422 = vadd.xlane.f32.xlu0 (!%p1728_p10), %v406_v0  ;;  %426 = vadd.xlane.f32.xlu1 (!%p1728_p10), %v408_v1  ;;  %v409_v3 = vld [vmem:[%s2743_s17 + $0x18] sm:$0xff] (!%p1728_p10)  ;;  %v410_v4 = vld [vmem:[%s2743_s17 + $0x20] sm:$0xff] (!%p1728_p10)  ;;  %v411_v5 = vld [vmem:[%s2743_s17 + $0x28] sm:$0xff] (!%p1728_p10)  ;;  %s3457_s10 = sld [smem:[#allocation42_spill]] (!%p1728_p10) }
  0x97   : > { %v412_v6 = vld [vmem:[%s2743_s17 + $0x30] sm:$0xff] (!%p1728_p10)  ;;  %v413_v7 = vld [vmem:[%s2743_s17 + $0x38] sm:$0xff] (!%p1728_p10)  ;;  %v414_v8 = vld [vmem:[%s2743_s17 + $0x40] sm:$0xff] (!%p1728_p10) }
  0x98   : > { %v415_v9 = vld [vmem:[%s2743_s17 + $0x48] sm:$0xff] (!%p1728_p10)  ;;  %v416_v10 = vld [vmem:[%s2743_s17 + $0x50] sm:$0xff] (!%p1728_p10)  ;;  %v2782_v11 = vld [vmem:[%s2743_s17 + $0x58] sm:$0xff] (!%p1728_p10) }
  0x99   : > { %v2786_v12 = vld [vmem:[%s2743_s17 + $0x60] sm:$0xff] (!%p1728_p10)  ;;  %v2789_v13 = vld [vmem:[%s2743_s17 + $0x68] sm:$0xff] (!%p1728_p10)  ;;  %v2794_v14 = vld [vmem:[%s2743_s17 + $0x70] sm:$0xff] (!%p1728_p10) }
  0x9a   : > { %424 = vadd.xlane.f32.xlu0 (!%p1728_p10), %v407_v2  ;;  %428 = vadd.xlane.f32.xlu1 (!%p1728_p10), %v409_v3  ;;  %v2797_v15 = vld [vmem:[%s2743_s17 + $0x78] sm:$0xff] (!%p1728_p10) }
  0x9e   : > { %430 = vadd.xlane.f32.xlu0 %v410_v4  ;;  %432 = vadd.xlane.f32.xlu1 %v411_v5 }
  0xa2   : > { %434 = vadd.xlane.f32.xlu0 %v412_v6  ;;  %436 = vadd.xlane.f32.xlu1 %v413_v7 }
  0xa6   : > { %438 = vadd.xlane.f32.xlu0 %v414_v8  ;;  %440 = vadd.xlane.f32.xlu1 %v415_v9 }
  0xaa   : > { %442 = vadd.xlane.f32.xlu0 %v416_v10  ;;  %444 = vadd.xlane.f32.xlu1 %v2782_v11 }
  0xae   : > { %446 = vadd.xlane.f32.xlu0 %v2786_v12  ;;  %448 = vadd.xlane.f32.xlu1 %v2789_v13 }
  0xb2   : > { %450 = vadd.xlane.f32.xlu0 %v2794_v14  ;;  %452 = vadd.xlane.f32.xlu1 %v2797_v15 }
 0x123   : > { %v423_v16 = vpop.xlane.xlu0 %422  ;;  %v427_v17 = vpop.xlane.xlu1 %426 }
 0x124   : > { %v455_v18 = vmul.f32 0.0078125, %v423_v16  ;;  %v457_v19 = vmul.f32 0.0078125, %v427_v17 }
 0x126   : > { %v2801_v20 = vsub.f32 %v406_v0, %v455_v18  ;;  %v2803_v21 = vsub.f32 %v408_v1, %v457_v19  ;;  %v2420_v18 = vmov 0.0  }
 0x127   : > { %v425_v22 = vpop.xlane.xlu0 %424  ;;  %v429_v23 = vpop.xlane.xlu1 %428  ;;  %661 = vst [vmem:[#allocation3] sm:$0xff] %v2420_v18  ;;  %662 = vst [vmem:[#allocation3 + $0x8] sm:$0xff] %v2420_v18 }
 0x128   : > { %v456_v24 = vmul.f32 0.0078125, %v425_v22  ;;  %v487_v25 = vmul.f32 %v2801_v20, %v2801_v20  ;;  %v458_v26 = vmul.f32 0.0078125, %v429_v23  ;;  %v489_v29 = vmul.f32 %v2803_v21, %v2803_v21  ;;  %663 = vst [vmem:[#allocation3 + $0x10] sm:$0xff] %v2420_v18  ;;  %664 = vst [vmem:[#allocation3 + $0x18] sm:$0xff] %v2420_v18 }
 0x129   : > { %665 = vst [vmem:[#allocation3 + $0x20] sm:$0xff] %v2420_v18  ;;  %666 = vst [vmem:[#allocation3 + $0x28] sm:$0xff] %v2420_v18 }
 0x12a   : > { %v2807_v27 = vsub.f32 %v407_v2, %v456_v24  ;;  %503 = vadd.xlane.f32.xlu0 %v487_v25  ;;  %v2809_v28 = vsub.f32 %v409_v3, %v458_v26  ;;  %667 = vst [vmem:[#allocation3 + $0x30] sm:$0xff] %v2420_v18  ;;  %668 = vst [vmem:[#allocation3 + $0x38] sm:$0xff] %v2420_v18 }
 0x12b   : > { %v431_v30 = vpop.xlane.xlu0 %430  ;;  %v433_v31 = vpop.xlane.xlu1 %432  ;;  %669 = vst [vmem:[#allocation3 + $0x40] sm:$0xff] %v2420_v18  ;;  %670 = vst [vmem:[#allocation3 + $0x48] sm:$0xff] %v2420_v18 }
 0x12c   : > { %v459_v32 = vmul.f32 0.0078125, %v431_v30  ;;  %v488_v33 = vmul.f32 %v2807_v27, %v2807_v27  ;;  %v460_v34 = vmul.f32 0.0078125, %v433_v31  ;;  %v490_v37 = vmul.f32 %v2809_v28, %v2809_v28  ;;  %671 = vst [vmem:[#allocation3 + $0x50] sm:$0xff] %v2420_v18  ;;  %672 = vst [vmem:[#allocation3 + $0x58] sm:$0xff] %v2420_v18 }
 0x12d   : > { %673 = vst [vmem:[#allocation3 + $0x60] sm:$0xff] %v2420_v18  ;;  %674 = vst [vmem:[#allocation3 + $0x68] sm:$0xff] %v2420_v18 }
 0x12e   : > { %v2815_v35 = vsub.f32 %v410_v4, %v459_v32  ;;  %507 = vadd.xlane.f32.xlu0 %v489_v29  ;;  %505 = vadd.xlane.f32.xlu1 %v488_v33  ;;  %v2817_v36 = vsub.f32 %v411_v5, %v460_v34  ;;  %675 = vst [vmem:[#allocation3 + $0x70] sm:$0xff] %v2420_v18  ;;  %676 = vst [vmem:[#allocation3 + $0x78] sm:$0xff] %v2420_v18 }
 0x12f   : > { %v435_v38 = vpop.xlane.xlu0 %434  ;;  %v437_v39 = vpop.xlane.xlu1 %436 }
 0x130   : > { %v461_v40 = vmul.f32 0.0078125, %v435_v38  ;;  %v491_v41 = vmul.f32 %v2815_v35, %v2815_v35  ;;  %v462_v42 = vmul.f32 0.0078125, %v437_v39  ;;  %v492_v45 = vmul.f32 %v2817_v36, %v2817_v36 }
 0x132   : > { %v2823_v43 = vsub.f32 %v412_v6, %v461_v40  ;;  %509 = vadd.xlane.f32.xlu1 %v490_v37  ;;  %511 = vadd.xlane.f32.xlu0 %v491_v41  ;;  %v2825_v44 = vsub.f32 %v413_v7, %v462_v42 }
 0x133   : > { %v439_v46 = vpop.xlane.xlu0 %438  ;;  %v441_v47 = vpop.xlane.xlu1 %440 }
 0x134   : > { %v463_v48 = vmul.f32 0.0078125, %v439_v46  ;;  %v493_v49 = vmul.f32 %v2823_v43, %v2823_v43  ;;  %v464_v50 = vmul.f32 0.0078125, %v441_v47  ;;  %v494_v53 = vmul.f32 %v2825_v44, %v2825_v44 }
 0x136   : > { %v2831_v51 = vsub.f32 %v414_v8, %v463_v48  ;;  %513 = vadd.xlane.f32.xlu1 %v492_v45  ;;  %515 = vadd.xlane.f32.xlu0 %v493_v49  ;;  %v2833_v52 = vsub.f32 %v415_v9, %v464_v50  ;;  %v2873_v45 = vld [vmem:[%s3456_s26] ss:$0 sm:$0xff] }
 0x137   : > { %v443_v54 = vpop.xlane.xlu0 %442  ;;  %v445_v55 = vpop.xlane.xlu1 %444 }
 0x138   : > { %v465_v56 = vmul.f32 0.0078125, %v443_v54  ;;  %v495_v57 = vmul.f32 %v2831_v51, %v2831_v51  ;;  %v466_v58 = vmul.f32 0.0078125, %v445_v55  ;;  %v496_v61 = vmul.f32 %v2833_v52, %v2833_v52 }
 0x13a   : > { %v2839_v59 = vsub.f32 %v416_v10, %v465_v56  ;;  %517 = vadd.xlane.f32.xlu1 %v494_v53  ;;  %519 = vadd.xlane.f32.xlu0 %v495_v57  ;;  %v2842_v60 = vsub.f32 %v2782_v11, %v466_v58  ;;  %v2879_v53 = vld [vmem:[%s3457_s10] ss:$0 sm:$0xff] }
 0x13b   : > { %v447_v62 = vpop.xlane.xlu0 %446  ;;  %v449_v63 = vpop.xlane.xlu1 %448 }
 0x13c   : > { %v467_v0 = vmul.f32 0.0078125, %v447_v62  ;;  %v497_v1 = vmul.f32 %v2839_v59, %v2839_v59  ;;  %v468_v2 = vmul.f32 0.0078125, %v449_v63  ;;  %v498_v5 = vmul.f32 %v2842_v60, %v2842_v60 }
 0x13e   : > { %v2849_v3 = vsub.f32 %v2786_v12, %v467_v0  ;;  %521 = vadd.xlane.f32.xlu1 %v496_v61  ;;  %523 = vadd.xlane.f32.xlu0 %v497_v1  ;;  %v2852_v4 = vsub.f32 %v2789_v13, %v468_v2 }
 0x13f   : > { %v451_v6 = vpop.xlane.xlu0 %450  ;;  %v453_v7 = vpop.xlane.xlu1 %452 }
 0x140   : > { %v469_v8 = vmul.f32 0.0078125, %v451_v6  ;;  %v499_v9 = vmul.f32 %v2849_v3, %v2849_v3  ;;  %v470_v10 = vmul.f32 0.0078125, %v453_v7  ;;  %v500_v13 = vmul.f32 %v2852_v4, %v2852_v4 }
 0x142   : > { %v2859_v11 = vsub.f32 %v2794_v14, %v469_v8  ;;  %525 = vadd.xlane.f32.xlu1 %v498_v5  ;;  %527 = vadd.xlane.f32.xlu0 %v499_v9  ;;  %v2862_v12 = vsub.f32 %v2797_v15, %v470_v10 }
 0x144   : > { %v501_v16 = vmul.f32 %v2859_v11, %v2859_v11  ;;  %v502_v17 = vmul.f32 %v2862_v12, %v2862_v12 }
 0x146   : > { %529 = vadd.xlane.f32.xlu1 %v500_v13  ;;  %531 = vadd.xlane.f32.xlu0 %v501_v16 }
 0x14a   : > { %533 = vadd.xlane.f32.xlu1 %v502_v17 }
 0x1b7   : > { %v504_v14 = vpop.xlane.xlu0 %503 }
 0x1b8   : > { %v535_v15 = vmul.f32 0.0078125, %v504_v14 }
 0x1ba   : > { %v551_v19 = vadd.f32 1e-05, %v535_v15 }
 0x1bb   : > { %v506_v22 = vpop.xlane.xlu1 %505  ;;  %v508_v23 = vpop.xlane.xlu0 %507 }
 0x1bc   : > { %2100 = vrsqrt.f32 %v551_v19  ;;  %v536_v24 = vmul.f32 0.0078125, %v506_v22  ;;  %v537_v25 = vmul.f32 0.0078125, %v508_v23 }
 0x1be   : > { %v552_v26 = vadd.f32 1e-05, %v536_v24  ;;  %v553_v29 = vadd.f32 1e-05, %v537_v25 }
 0x1bf   : > { %v510_v30 = vpop.xlane.xlu1 %509  ;;  %v512_v31 = vpop.xlane.xlu0 %511 }
 0x1c0   : > { %2102 = vrsqrt.f32 %v552_v26  ;;  %v538_v32 = vmul.f32 0.0078125, %v510_v30  ;;  %v539_v33 = vmul.f32 0.0078125, %v512_v31 }
 0x1c1   : > { %2104 = vrsqrt.f32 %v553_v29 }
 0x1c2   : > { %v554_v34 = vadd.f32 1e-05, %v538_v32  ;;  %v555_v37 = vadd.f32 1e-05, %v539_v33 }
 0x1c3   : > { %v514_v38 = vpop.xlane.xlu1 %513  ;;  %v516_v39 = vpop.xlane.xlu0 %515 }
 0x1c4   : > { %2106 = vrsqrt.f32 %v554_v34  ;;  %v540_v40 = vmul.f32 0.0078125, %v514_v38  ;;  %v541_v41 = vmul.f32 0.0078125, %v516_v39 }
 0x1c5   : > { %2108 = vrsqrt.f32 %v555_v37 }
 0x1c6   : > { %v2101_v42 = vpop.eup %2100  ;;  %v556_v46 = vadd.f32 1e-05, %v540_v40  ;;  %v557_v47 = vadd.f32 1e-05, %v541_v41 }
 0x1c7   : > { %v583_v48 = vmul.f32 %v2101_v42, %v2801_v20  ;;  %v518_v49 = vpop.xlane.xlu1 %517  ;;  %v520_v50 = vpop.xlane.xlu0 %519 }
 0x1c8   : > { %2110 = vrsqrt.f32 %v556_v46  ;;  %v542_v54 = vmul.f32 0.0078125, %v518_v49  ;;  %v543_v55 = vmul.f32 0.0078125, %v520_v50 }
 0x1c9   : > { %v606_v56 = vmul.f32 %v2873_v45, %v583_v48  ;;  %2112 = vrsqrt.f32 %v557_v47 }
 0x1ca   : > { %v2103_v57 = vpop.eup %2102  ;;  %v558_v58 = vadd.f32 1e-05, %v542_v54  ;;  %v559_v61 = vadd.f32 1e-05, %v543_v55 }
 0x1cb   : > { %v2105_v62 = vpop.eup %2104  ;;  %v629_v63 = vadd.f32 %v2879_v53, %v606_v56  ;;  %v584_v20 = vmul.f32 %v2103_v57, %v2807_v27  ;;  %v522_v0 = vpop.xlane.xlu1 %521 }
 0x1cc   : > { %v524_v1 = vpop.xlane.xlu0 %523  ;;  %v585_v2 = vmul.f32 %v2105_v62, %v2803_v21  ;;  %2114 = vrsqrt.f32 %v558_v58  ;;  %v544_v5 = vmul.f32 0.0078125, %v522_v0 }
 0x1cd   : > { %v545_v6 = vmul.f32 0.0078125, %v524_v1  ;;  %645 = vst [vmem:[#allocation2] sm:$0xff] %v629_v63  ;;  %v607_v7 = vmul.f32 %v2873_v45, %v584_v20  ;;  %2116 = vrsqrt.f32 %v559_v61 }
 0x1ce   : > { %v2107_v8 = vpop.eup %2106  ;;  %v608_v9 = vmul.f32 %v2873_v45, %v585_v2  ;;  %v560_v10 = vadd.f32 1e-05, %v544_v5 }
 0x1cf   : > { %v561_v13 = vadd.f32 1e-05, %v545_v6  ;;  %v2109_v16 = vpop.eup %2108  ;;  %v630_v17 = vadd.f32 %v2879_v53, %v607_v7  ;;  %v586_v27 = vmul.f32 %v2107_v8, %v2809_v28  ;;  %v526_v18 = vpop.xlane.xlu1 %525 }
 0x1d0   : > { %v528_v14 = vpop.xlane.xlu0 %527  ;;  %v631_v21 = vadd.f32 %v2879_v53, %v608_v9  ;;  %v587_v15 = vmul.f32 %v2109_v16, %v2815_v35  ;;  %2118 = vrsqrt.f32 %v560_v10  ;;  %v546_v19 = vmul.f32 0.0078125, %v526_v18 }
 0x1d1   : > { %646 = vst [vmem:[#allocation2 + $0x8] sm:$0xff] %v630_v17  ;;  %v609_v22 = vmul.f32 %v2873_v45, %v586_v27  ;;  %2120 = vrsqrt.f32 %v561_v13  ;;  %v547_v23 = vmul.f32 0.0078125, %v528_v14 }
 0x1d2   : > { %v2111_v24 = vpop.eup %2110  ;;  %647 = vst [vmem:[#allocation2 + $0x10] sm:$0xff] %v631_v21  ;;  %v610_v25 = vmul.f32 %v2873_v45, %v587_v15  ;;  %v562_v26 = vadd.f32 1e-05, %v546_v19 }
 0x1d3   : > { %v2113_v29 = vpop.eup %2112  ;;  %v632_v28 = vadd.f32 %v2879_v53, %v609_v22  ;;  %v588_v30 = vmul.f32 %v2111_v24, %v2817_v36  ;;  %v563_v31 = vadd.f32 1e-05, %v547_v23  ;;  %v530_v32 = vpop.xlane.xlu1 %529 }
 0x1d4   : > { %v532_v35 = vpop.xlane.xlu0 %531  ;;  %v633_v33 = vadd.f32 %v2879_v53, %v610_v25  ;;  %v589_v34 = vmul.f32 %v2113_v29, %v2823_v43  ;;  %2122 = vrsqrt.f32 %v562_v26  ;;  %v548_v37 = vmul.f32 0.0078125, %v530_v32 }
 0x1d5   : > { %648 = vst [vmem:[#allocation2 + $0x18] sm:$0xff] %v632_v28  ;;  %v611_v38 = vmul.f32 %v2873_v45, %v588_v30  ;;  %2124 = vrsqrt.f32 %v563_v31  ;;  %v549_v39 = vmul.f32 0.0078125, %v532_v35 }
 0x1d6   : > { %v2115_v40 = vpop.eup %2114  ;;  %649 = vst [vmem:[#allocation2 + $0x20] sm:$0xff] %v633_v33  ;;  %v612_v41 = vmul.f32 %v2873_v45, %v589_v34  ;;  %v564_v42 = vadd.f32 1e-05, %v548_v37 }
 0x1d7   : > { %v2117_v36 = vpop.eup %2116  ;;  %v634_v46 = vadd.f32 %v2879_v53, %v611_v38  ;;  %v590_v47 = vmul.f32 %v2115_v40, %v2825_v44  ;;  %v565_v48 = vadd.f32 1e-05, %v549_v39  ;;  %v534_v49 = vpop.xlane.xlu1 %533 }
 0x1d8   : > { %v635_v43 = vadd.f32 %v2879_v53, %v612_v41  ;;  %v591_v50 = vmul.f32 %v2117_v36, %v2831_v51  ;;  %2126 = vrsqrt.f32 %v564_v42  ;;  %v550_v54 = vmul.f32 0.0078125, %v534_v49 }
 0x1d9   : > { %650 = vst [vmem:[#allocation2 + $0x28] sm:$0xff] %v634_v46  ;;  %v613_v55 = vmul.f32 %v2873_v45, %v590_v47  ;;  %2128 = vrsqrt.f32 %v565_v48 }
 0x1da   : > { %v2119_v56 = vpop.eup %2118  ;;  %651 = vst [vmem:[#allocation2 + $0x30] sm:$0xff] %v635_v43  ;;  %v614_v57 = vmul.f32 %v2873_v45, %v591_v50  ;;  %v566_v58 = vadd.f32 1e-05, %v550_v54 }
 0x1db   : > { %v2121_v61 = vpop.eup %2120  ;;  %v636_v44 = vadd.f32 %v2879_v53, %v613_v55  ;;  %v592_v62 = vmul.f32 %v2119_v56, %v2833_v52 }
 0x1dc   : > { %v637_v63 = vadd.f32 %v2879_v53, %v614_v57  ;;  %v593_v51 = vmul.f32 %v2121_v61, %v2839_v59  ;;  %2130 = vrsqrt.f32 %v566_v58 }
 0x1dd   : > { %652 = vst [vmem:[#allocation2 + $0x38] sm:$0xff] %v636_v44  ;;  %v615_v20 = vmul.f32 %v2873_v45, %v592_v62 }
 0x1de   : > { %v2123_v0 = vpop.eup %2122  ;;  %653 = vst [vmem:[#allocation2 + $0x40] sm:$0xff] %v637_v63  ;;  %v616_v1 = vmul.f32 %v2873_v45, %v593_v51 }
 0x1df   : > { %v2125_v2 = vpop.eup %2124  ;;  %v638_v5 = vadd.f32 %v2879_v53, %v615_v20  ;;  %v594_v6 = vmul.f32 %v2123_v0, %v2842_v60 }
 0x1e0   : > { %v639_v7 = vadd.f32 %v2879_v53, %v616_v1  ;;  %v595_v52 = vmul.f32 %v2125_v2, %v2849_v3 }
 0x1e1   : > { %654 = vst [vmem:[#allocation2 + $0x48] sm:$0xff] %v638_v5  ;;  %v617_v59 = vmul.f32 %v2873_v45, %v594_v6 }
 0x1e2   : > { %v2127_v8 = vpop.eup %2126  ;;  %655 = vst [vmem:[#allocation2 + $0x50] sm:$0xff] %v639_v7  ;;  %v618_v9 = vmul.f32 %v2873_v45, %v595_v52 }
 0x1e3   : > { %v2129_v10 = vpop.eup %2128  ;;  %v640_v13 = vadd.f32 %v2879_v53, %v617_v59  ;;  %v596_v16 = vmul.f32 %v2127_v8, %v2852_v4 }
 0x1e4   : > { %v641_v17 = vadd.f32 %v2879_v53, %v618_v9  ;;  %v597_v60 = vmul.f32 %v2129_v10, %v2859_v11 }
 0x1e5   : > { %656 = vst [vmem:[#allocation2 + $0x58] sm:$0xff] %v640_v13  ;;  %v619_v27 = vmul.f32 %v2873_v45, %v596_v16 }
 0x1e6   : > { %v2131_v3 = vpop.eup %2130  ;;  %657 = vst [vmem:[#allocation2 + $0x60] sm:$0xff] %v641_v17  ;;  %v620_v18 = vmul.f32 %v2873_v45, %v597_v60 }
 0x1e7   : > { %v642_v14 = vadd.f32 %v2879_v53, %v619_v27  ;;  %v598_v21 = vmul.f32 %v2131_v3, %v2862_v12 }
 0x1e8   : > { %v643_v15 = vadd.f32 %v2879_v53, %v620_v18 }
 0x1e9   : > { %658 = vst [vmem:[#allocation2 + $0x68] sm:$0xff] %v642_v14  ;;  %v621_v4 = vmul.f32 %v2873_v45, %v598_v21 }
 0x1ea   : > { %659 = vst [vmem:[#allocation2 + $0x70] sm:$0xff] %v643_v15 }
 0x1eb   : > { %v644_v19 = vadd.f32 %v2879_v53, %v621_v4 }
 0x1ed   : > { %660 = vst [vmem:[#allocation2 + $0x78] sm:$0xff] %v644_v19 }
 0x1ee PF: > { %v693_v11 = vld [vmem:[%s2751_s1] sm:$0xff]  ;;  %v694_v12 = vld [vmem:[%s2751_s1 + $0x8] sm:$0xff]  ;;  %v695_v22 = vld [vmem:[%s2751_s1 + $0x10] sm:$0xff]  ;;  %p1732_p2 = scmp.ne.s32.totalorder %s2396_s30, 1 }
 0x1ef   : > { %v1918_v23 = vpack.c.bf16 %v694_v12, %v693_v11  ;;  %v696_v24 = vld [vmem:[%s2751_s1 + $0x18] sm:$0xff]  ;;  %v697_v25 = vld [vmem:[%s2751_s1 + $0x20] sm:$0xff]  ;;  %v698_v53 = vld [vmem:[%s2751_s1 + $0x28] sm:$0xff]  ;;  %s3496_s16 = sld [smem:[#allocation44_spill]] (!%p1732_p2) }
 0x1f0   : > { %v1922_v45 = vpack.c.bf16 %v696_v24, %v695_v22  ;;  %v1926_v26 = vpack.c.bf16 %v698_v53, %v697_v25  ;;  %v677_v29 = vld [vmem:[#allocation2] sm:$0xff]  ;;  %v699_v28 = vld [vmem:[%s2751_s1 + $0x30] sm:$0xff]  ;;  %v700_v30 = vld [vmem:[%s2751_s1 + $0x38] sm:$0xff] }
 0x1f1   : > { %1919 = vmatprep.subr.bf16.mxu0 %v1918_v23  ;;  %1838 = vmatprep.mubr.f32.mxu0 %v677_v29  ;;  %v1930_v31 = vpack.c.bf16 %v700_v30, %v699_v28  ;;  %v701_v32 = vld [vmem:[%s2751_s1 + $0x40] sm:$0xff]  ;;  %v702_v35 = vld [vmem:[%s2751_s1 + $0x48] sm:$0xff]  ;;  %v703_v34 = vld [vmem:[%s2751_s1 + $0x50] sm:$0xff] }
 0x1f2   : > { %1921 = vmatpush3.bf16.msra.mxu0 %v1918_v23  ;;  %v1934_v33 = vpack.c.bf16 %v702_v35, %v701_v32  ;;  %v704_v37 = vld [vmem:[%s2751_s1 + $0x58] sm:$0xff]  ;;  %v705_v39 = vld [vmem:[%s2751_s1 + $0x60] sm:$0xff]  ;;  %v706_v40 = vld [vmem:[%s2751_s1 + $0x68] sm:$0xff] }
 0x1f3   : > { %1923 = vmatprep.subr.bf16.mxu0 %v1922_v45  ;;  %v1938_v38 = vpack.c.bf16 %v704_v37, %v703_v34  ;;  %v1942_v41 = vpack.c.bf16 %v706_v40, %v705_v39  ;;  %v707_v42 = vld [vmem:[%s2751_s1 + $0x70] sm:$0xff]  ;;  %v708_v36 = vld [vmem:[%s2751_s1 + $0x78] sm:$0xff]  ;;  %v678_v47 = vld [vmem:[#allocation2 + $0x8] sm:$0xff] }
 0x1f4   : > { %v1946_v46 = vpack.c.bf16 %v708_v36, %v707_v42  ;;  %v679_v48 = vld [vmem:[#allocation2 + $0x10] sm:$0xff]  ;;  %v680_v49 = vld [vmem:[#allocation2 + $0x18] sm:$0xff]  ;;  %v681_v43 = vld [vmem:[#allocation2 + $0x20] sm:$0xff] }
 0x1f5   : > { %v682_v50 = vld [vmem:[#allocation2 + $0x28] sm:$0xff]  ;;  %v683_v54 = vld [vmem:[#allocation2 + $0x30] sm:$0xff]  ;;  %v684_v55 = vld [vmem:[#allocation2 + $0x38] sm:$0xff] }
 0x1f6   : > { %1925 = vmatpush3.bf16.msra.mxu0 %v1922_v45  ;;  %v685_v56 = vld [vmem:[#allocation2 + $0x40] sm:$0xff]  ;;  %v686_v57 = vld [vmem:[#allocation2 + $0x48] sm:$0xff]  ;;  %v687_v58 = vld [vmem:[#allocation2 + $0x50] sm:$0xff] }
 0x1f7   : > { %1927 = vmatprep.subr.bf16.mxu0 %v1926_v26  ;;  %v688_v61 = vld [vmem:[#allocation2 + $0x58] sm:$0xff]  ;;  %v689_v44 = vld [vmem:[#allocation2 + $0x60] sm:$0xff]  ;;  %v690_v62 = vld [vmem:[#allocation2 + $0x68] sm:$0xff] }
 0x1f8   : > { %v691_v63 = vld [vmem:[#allocation2 + $0x70] sm:$0xff]  ;;  %v692_v51 = vld [vmem:[#allocation2 + $0x78] sm:$0xff]  ;;  %v1309_v20 = vld [vmem:[%s2765_s18] sm:$0xff] }
 0x1f9   : > { %v1310_v0 = vld [vmem:[%s2765_s18 + $0x8] sm:$0xff]  ;;  %v1311_v2 = vld [vmem:[%s2765_s18 + $0x10] sm:$0xff]  ;;  %v1312_v5 = vld [vmem:[%s2765_s18 + $0x18] sm:$0xff] }
 0x1fa   : > { %1929 = vmatpush3.bf16.msra.mxu0 %v1926_v26  ;;  %v1950_v1 = vpack.c.bf16 %v1310_v0, %v1309_v20  ;;  %v1954_v6 = vpack.c.bf16 %v1312_v5, %v1311_v2  ;;  %v1313_v7 = vld [vmem:[%s2765_s18 + $0x20] sm:$0xff]  ;;  %v1314_v52 = vld [vmem:[%s2765_s18 + $0x28] sm:$0xff]  ;;  %v1315_v8 = vld [vmem:[%s2765_s18 + $0x30] sm:$0xff] }
 0x1fb   : > { %1931 = vmatprep.subr.bf16.mxu0 %v1930_v31  ;;  %v1958_v59 = vpack.c.bf16 %v1314_v52, %v1313_v7  ;;  %v1316_v9 = vld [vmem:[%s2765_s18 + $0x38] sm:$0xff]  ;;  %v1317_v13 = vld [vmem:[%s2765_s18 + $0x40] sm:$0xff]  ;;  %v1318_v16 = vld [vmem:[%s2765_s18 + $0x48] sm:$0xff] }
 0x1fc   : > { %1951 = vmatprep.subr.bf16.mxu1 %v1950_v1  ;;  %v1962_v10 = vpack.c.bf16 %v1316_v9, %v1315_v8  ;;  %v1966_v17 = vpack.c.bf16 %v1318_v16, %v1317_v13  ;;  %v1319_v60 = vld [vmem:[%s2765_s18 + $0x50] sm:$0xff]  ;;  %v1320_v27 = vld [vmem:[%s2765_s18 + $0x58] sm:$0xff]  ;;  %v1321_v18 = vld [vmem:[%s2765_s18 + $0x60] sm:$0xff] }
 0x1fd   : > { %1953 = vmatpush3.bf16.msra.mxu1 %v1950_v1  ;;  %v1970_v3 = vpack.c.bf16 %v1320_v27, %v1319_v60  ;;  %v1322_v14 = vld [vmem:[%s2765_s18 + $0x68] sm:$0xff]  ;;  %v1323_v21 = vld [vmem:[%s2765_s18 + $0x70] sm:$0xff]  ;;  %v1324_v4 = vld [vmem:[%s2765_s18 + $0x78] sm:$0xff] }
 0x1fe   : > { %1933 = vmatpush3.bf16.msra.mxu0 %v1930_v31  ;;  %1955 = vmatprep.subr.bf16.mxu1 %v1954_v6  ;;  %v1974_v15 = vpack.c.bf16 %v1322_v14, %v1321_v18  ;;  %v1978_v19 = vpack.c.bf16 %v1324_v4, %v1323_v21  ;;  %v2965_v11 = vld [vmem:[%s399_s12] ss:$0 sm:$0xff] }
 0x1ff   : > { %1935 = vmatprep.subr.bf16.mxu0 %v1934_v33 }
 0x201   : > { %1957 = vmatpush3.bf16.msra.mxu1 %v1954_v6 }
 0x202   : > { %1937 = vmatpush3.bf16.msra.mxu0 %v1934_v33  ;;  %1959 = vmatprep.subr.bf16.mxu1 %v1958_v59 }
 0x203   : > { %1939 = vmatprep.subr.bf16.mxu0 %v1938_v38 }
 0x205   : > { %1961 = vmatpush3.bf16.msra.mxu1 %v1958_v59 }
 0x206   : > { %1941 = vmatpush3.bf16.msra.mxu0 %v1938_v38  ;;  %1963 = vmatprep.subr.bf16.mxu1 %v1962_v10 }
 0x207   : > { %1943 = vmatprep.subr.bf16.mxu0 %v1942_v41 }
 0x209   : > { %1965 = vmatpush3.bf16.msra.mxu1 %v1962_v10 }
 0x20a   : > { %1945 = vmatpush3.bf16.msra.mxu0 %v1942_v41  ;;  %1967 = vmatprep.subr.bf16.mxu1 %v1966_v17 }
 0x20b   : > { %1947 = vmatprep.subr.bf16.mxu0 %v1946_v46 }
 0x20d   : > { %1969 = vmatpush3.bf16.msra.mxu1 %v1966_v17 }
 0x20e   : > { %1949 = vmatpush3.bf16.msra.mxu0 %v1946_v46  ;;  %1971 = vmatprep.subr.bf16.mxu1 %v1970_v3 }
 0x211   : > { %1839 = vmatmul.mubr.f32.vlgmr.msra.gmra.mrb[0].mxu0 %v678_v47  ;;  %1973 = vmatpush3.bf16.msra.mxu1 %v1970_v3 }
 0x212   : > { %1841 = vmatprep.mubr.f32.mxu0 %v679_v48  ;;  %1975 = vmatprep.subr.bf16.mxu1 %v1974_v15 }
 0x215   : > { %1842 = vmatmul.mubr.f32.gmra.mrb[2].mxu0 %v680_v49  ;;  %1977 = vmatpush3.bf16.msra.mxu1 %v1974_v15 }
 0x216   : > { %1844 = vmatprep.mubr.f32.mxu0 %v681_v43  ;;  %1979 = vmatprep.subr.bf16.mxu1 %v1978_v19 }
 0x219   : > { %1845 = vmatmul.mubr.f32.gmra.mrb[4].mxu0 %v682_v50  ;;  %1981 = vmatpush3.bf16.msra.mxu1 %v1978_v19 }
 0x21a   : > { %1847 = vmatprep.mubr.f32.mxu0 %v683_v54 }
 0x21d   : > { %1848 = vmatmul.mubr.f32.gmra.mrb[6].mxu0 %v684_v55 }
 0x21e   : > { %1850 = vmatprep.mubr.f32.mxu0 %v685_v56 }
 0x221   : > { %1851 = vmatmul.mubr.f32.gmra.mrb[8].mxu0 %v686_v57 }
 0x222   : > { %1853 = vmatprep.mubr.f32.mxu0 %v687_v58 }
 0x225   : > { %1854 = vmatmul.mubr.f32.gmra.mrb[10].mxu0 %v688_v61 }
 0x226   : > { %1856 = vmatprep.mubr.f32.mxu0 %v689_v44 }
 0x229   : > { %1857 = vmatmul.mubr.f32.gmra.mrb[12].mxu0 %v690_v62 }
 0x22a   : > { %1859 = vmatprep.mubr.f32.mxu0 %v691_v63 }
 0x22d   : > { %1860 = vmatmul.mubr.f32.gmra.mrb[14].mxu0 %v692_v51 }
 0x2e4   : > { %v1840_v12 = vpop.f32.mrb[0].mxu0 }
 0x2e5   : > { %v788_v22 = vadd.f32 %v1840_v12, %v2965_v11  ;;  %v782_v23 = vpop.f32.mrb[1].mxu0 }
 0x2e6   : > { %v783_v24 = vadd.f32 %v2965_v11, %v782_v23 }
 0x2e7   : > { %v2969_v45 = vmul.f32 0.70710677, %v788_v22  ;;  %v2984_v50 = vmul.f32 0.5, %v788_v22 }
 0x2e8   : > { %v2971_v25 = vmul.f32 0.70710677, %v783_v24  ;;  %v1843_v53 = vpop.f32.mrb[2].mxu0  ;;  %v2989_v44 = vmul.f32 0.5, %v783_v24 }
 0x2e9   : > { %v894_v26 = vand.u32 2147483647, %v2969_v45  ;;  %v798_v29 = vadd.f32 %v1843_v53, %v2965_v11  ;;  %v792_v28 = vpop.f32.mrb[3].mxu0  ;;  %vm1214_vm1 = vcmp.ge.f32.partialorder %v2969_v45, 0.0 }
 0x2ea   : > { %v893_v30 = vand.u32 2147483647, %v2971_v25  ;;  %v793_v31 = vadd.f32 %v2965_v11, %v792_v28  ;;  %vm1213_vm0 = vcmp.ge.f32.partialorder %v2971_v25, 0.0 }
 0x2eb   : > { %v2977_v32 = vmul.f32 0.70710677, %v798_v29  ;;  %v910_v35 = vmul.f32 0.3275911, %v894_v26  ;;  %v1118_v34 = vsub.f32 0.0, %v894_v26  ;;  %v2991_v62 = vmul.f32 0.5, %v798_v29 }
 0x2ec   : > { %v2979_v33 = vmul.f32 0.70710677, %v793_v31  ;;  %v1846_v38 = vpop.f32.mrb[4].mxu0  ;;  %v1117_v39 = vsub.f32 0.0, %v893_v30  ;;  %v909_v42 = vmul.f32 0.3275911, %v893_v30 }
 0x2ed   : > { %v896_v37 = vand.u32 2147483647, %v2977_v32  ;;  %v802_v41 = vpop.f32.mrb[5].mxu0  ;;  %v926_v36 = vadd.f32 1.0, %v910_v35  ;;  %v1134_v47 = vmul.f32 %v1118_v34, %v894_v26  ;;  %v808_v49 = vadd.f32 %v1846_v38, %v2965_v11 }
 0x2ee   : > { %v895_v40 = vand.u32 2147483647, %v2979_v33  ;;  %v1133_v54 = vmul.f32 %v1117_v39, %v893_v30  ;;  %v803_v56 = vadd.f32 %v2965_v11, %v802_v41  ;;  %v925_v57 = vadd.f32 1.0, %v909_v42 }
 0x2ef   : > { %v1120_v48 = vsub.f32 0.0, %v896_v37  ;;  %v912_v58 = vmul.f32 0.3275911, %v896_v37  ;;  %v2987_v61 = vmul.f32 0.70710677, %v808_v49  ;;  %2132 = vrcp.f32 %v926_v36 }
 0x2f0   : > { %v1849_v46 = vpop.f32.mrb[6].mxu0  ;;  %v1119_v55 = vsub.f32 0.0, %v895_v40  ;;  %v911_v63 = vmul.f32 0.3275911, %v895_v40  ;;  %v2993_v51 = vmul.f32 0.70710677, %v803_v56  ;;  %2134 = vrcp.f32 %v925_v57 }
 0x2f1   : > { %v812_v43 = vpop.f32.mrb[7].mxu0  ;;  %v1151_v0 = vmul.f32 1.442695, %v1134_v47  ;;  %v1136_v1 = vmul.f32 %v1120_v48, %v896_v37  ;;  %v898_v2 = vand.u32 2147483647, %v2987_v61  ;;  %v818_v5 = vadd.f32 %v1849_v46, %v2965_v11 }
 0x2f2   : > { %v1149_v7 = vmul.f32 1.442695, %v1133_v54  ;;  %v1135_v52 = vmul.f32 %v1119_v55, %v895_v40  ;;  %v897_v59 = vand.u32 2147483647, %v2993_v51  ;;  %v813_v8 = vadd.f32 %v2965_v11, %v812_v43 }
 0x2f3   : > { %v928_v9 = vadd.f32 1.0, %v912_v58  ;;  %v914_v10 = vmul.f32 0.3275911, %v898_v2  ;;  %v2999_v13 = vmul.f32 0.70710677, %v818_v5  ;;  %v927_v16 = vadd.f32 1.0, %v911_v63 }
 0x2f4   : > { %v1852_v20 = vpop.f32.mrb[8].mxu0  ;;  %v1122_v17 = vsub.f32 0.0, %v898_v2  ;;  %v913_v60 = vmul.f32 0.3275911, %v897_v59  ;;  %v3001_v27 = vmul.f32 0.70710677, %v813_v8  ;;  %2136 = vpow2.f32 %v1151_v0 }
 0x2f5   : > { %v822_v6 = vpop.f32.mrb[9].mxu0  ;;  %v1155_v3 = vmul.f32 1.442695, %v1136_v1  ;;  %v1121_v18 = vsub.f32 0.0, %v897_v59  ;;  %v900_v14 = vand.u32 2147483647, %v2999_v13  ;;  %2138 = vpow2.f32 %v1149_v7 }
 0x2f6   : > { %v3004_v15 = vmul.f32 0.5, %v793_v31  ;;  %v1153_v4 = vmul.f32 1.442695, %v1135_v52  ;;  %v899_v19 = vand.u32 2147483647, %v3001_v27  ;;  %2140 = vrcp.f32 %v928_v9 }
 0x2f7   : > { %v3007_v22 = vmul.f32 0.5, %v808_v49  ;;  %v930_v23 = vadd.f32 1.0, %v914_v10  ;;  %v1124_v24 = vsub.f32 0.0, %v900_v14  ;;  %2142 = vrcp.f32 %v927_v16 }
 0x2f8   : > { %v1855_v21 = vpop.f32.mrb[10].mxu0  ;;  %v1138_v53 = vmul.f32 %v1122_v17, %v898_v2  ;;  %v3009_v26 = vmul.f32 0.5, %v803_v56  ;;  %v929_v29 = vadd.f32 1.0, %v913_v60  ;;  %2144 = vpow2.f32 %v1155_v3 }
 0x2f9   : > { %v832_v12 = vpop.f32.mrb[11].mxu0  ;;  %v1137_v30 = vmul.f32 %v1121_v18, %v897_v59  ;;  %v1123_v31 = vsub.f32 0.0, %v899_v19  ;;  %v3014_v35 = vadd.f32 %v1852_v20, %v2965_v11  ;;  %v3018_v37 = vpop.eup %2132  ;;  %2146 = vpow2.f32 %v1153_v4 }
 0x2fa   : > { %v916_v38 = vmul.f32 0.3275911, %v900_v14  ;;  %v1140_v39 = vmul.f32 %v1124_v24, %v900_v14  ;;  %v3021_v40 = vadd.f32 %v2965_v11, %v822_v6  ;;  %2148 = vrcp.f32 %v930_v23  ;;  %v3033_v43 = vpop.eup %2134 }
 0x2fb   : > { %v3023_v41 = vmul.f32 0.5, %v818_v5  ;;  %v915_v42 = vmul.f32 0.3275911, %v899_v19  ;;  %v3026_v36 = vmul.f32 0.70710677, %v3014_v35  ;;  %2150 = vrcp.f32 %v929_v29 }
 0x2fc   : > { %v3011_v28 = vpop.f32.mrb[12].mxu0  ;;  %v1159_v46 = vmul.f32 1.442695, %v1138_v53  ;;  %v3028_v47 = vmul.f32 0.5, %v813_v8  ;;  %v3031_v48 = vmul.f32 0.70710677, %v3021_v40  ;;  %v1139_v55 = vmul.f32 %v1123_v31, %v899_v19 }
 0x2fd   : > { %v3016_v34 = vpop.f32.mrb[13].mxu0  ;;  %v1157_v54 = vmul.f32 1.442695, %v1137_v30  ;;  %v902_v56 = vand.u32 2147483647, %v3026_v36  ;;  %v3037_v57 = vadd.f32 %v1855_v21, %v2965_v11  ;;  %v932_v63 = vadd.f32 1.0, %v916_v38 }
 0x2fe   : > { %v1163_v20 = vmul.f32 1.442695, %v1140_v39  ;;  %v901_v0 = vand.u32 2147483647, %v3031_v48  ;;  %v833_v1 = vadd.f32 %v2965_v11, %v832_v12  ;;  %v3041_v2 = vpop.eup %2136  ;;  %v931_v5 = vadd.f32 1.0, %v915_v42 }
 0x2ff   : > { %3458 = vst [vmem:[#allocation22_spill] sm:$0xff] %v3037_v57  ;;  %v918_v6 = vmul.f32 0.3275911, %v902_v56  ;;  %v1126_v7 = vsub.f32 0.0, %v902_v56  ;;  %v3044_v52 = vmul.f32 0.70710677, %v3037_v57  ;;  %v3046_v59 = vpop.eup %2138  ;;  %2152 = vpow2.f32 %v1159_v46 }
 0x300   : > { %v1861_v49 = vpop.f32.mrb[14].mxu0  ;;  %v917_v8 = vmul.f32 0.3275911, %v901_v0  ;;  %v1125_v9 = vsub.f32 0.0, %v901_v0  ;;  %v3048_v10 = vmul.f32 0.70710677, %v833_v1  ;;  %v3050_v16 = vpop.eup %2140  ;;  %2154 = vpow2.f32 %v1157_v54 }
 0x301   : > { %v852_v58 = vpop.f32.mrb[15].mxu0  ;;  %v1161_v17 = vmul.f32 1.442695, %v1139_v55  ;;  %v1142_v60 = vmul.f32 %v1126_v7, %v902_v56  ;;  %v904_v3 = vand.u32 2147483647, %v3044_v52  ;;  %v3053_v18 = vpop.eup %2142  ;;  %2156 = vrcp.f32 %v932_v63 }
 0x302   : > { %v934_v14 = vadd.f32 1.0, %v918_v6  ;;  %v1141_v21 = vmul.f32 %v1125_v9, %v901_v0  ;;  %v903_v4 = vand.u32 2147483647, %v3048_v10  ;;  %v3056_v19 = vpop.eup %2144  ;;  %2158 = vrcp.f32 %v931_v5 }
 0x303   : > { %v933_v12 = vadd.f32 1.0, %v917_v8  ;;  %v920_v23 = vmul.f32 0.3275911, %v904_v3  ;;  %v1128_v24 = vsub.f32 0.0, %v904_v3  ;;  %v3058_v53 = vpop.eup %2146  ;;  %2160 = vpow2.f32 %v1163_v20 }
 0x304   : > { %v1167_v29 = vmul.f32 1.442695, %v1142_v60  ;;  %v919_v30 = vmul.f32 0.3275911, %v903_v4  ;;  %v1127_v31 = vsub.f32 0.0, %v903_v4  ;;  %v3060_v38 = vpop.eup %2148  ;;  %2162 = vpow2.f32 %v1161_v17 }
 0x305   : > { %v1165_v39 = vmul.f32 1.442695, %v1141_v21  ;;  %v1144_v42 = vmul.f32 %v1128_v24, %v904_v3  ;;  %v3064_v46 = vadd.f32 %v3011_v28, %v2965_v11  ;;  %v3066_v54 = vpop.eup %2150  ;;  %2164 = vrcp.f32 %v934_v14 }
 0x306   : > { %v936_v55 = vadd.f32 1.0, %v920_v23  ;;  %v1143_v56 = vmul.f32 %v1127_v31, %v903_v4  ;;  %v843_v63 = vadd.f32 %v2965_v11, %v3016_v34  ;;  %v3071_v20 = vmul.f32 0.5, %v3014_v35 }
 0x307   : > { %3459 = vst [vmem:[#allocation23_spill] sm:$0xff] %v3064_v46  ;;  %2166 = vrcp.f32 %v933_v12  ;;  %v935_v0 = vadd.f32 1.0, %v919_v30  ;;  %v3074_v5 = vmul.f32 0.70710677, %v3064_v46  ;;  %v3077_v28 = vmul.f32 0.5, %v3021_v40 }
 0x308   : > { %3460 = vst [vmem:[#allocation24_spill] sm:$0xff] %v3071_v20  ;;  %2168 = vpow2.f32 %v1167_v29  ;;  %v3079_v6 = vmul.f32 0.5, %v833_v1  ;;  %v3081_v7 = vmul.f32 0.70710677, %v843_v63  ;;  %v1171_v8 = vmul.f32 1.442695, %v1144_v42 }
 0x309   : > { %3461 = vst [vmem:[#allocation25_spill] sm:$0xff] %v3074_v5  ;;  %3462 = vst [vmem:[#allocation26_spill] sm:$0xff] %v3077_v28  ;;  %2170 = vpow2.f32 %v1165_v39  ;;  %v906_v34 = vand.u32 2147483647, %v3074_v5  ;;  %v3085_v35 = vadd.f32 %v1861_v49, %v2965_v11  ;;  %v3087_v9 = vpop.eup %2152  ;;  %v1169_v17 = vmul.f32 1.442695, %v1143_v56 }
 0x30a   : > { %3463 = vst [vmem:[#allocation27_spill] sm:$0xff] %v3079_v6  ;;  %3464 = vst [vmem:[#allocation28_spill] sm:$0xff] %v3081_v7  ;;  %2172 = vrcp.f32 %v936_v55  ;;  %v905_v60 = vand.u32 2147483647, %v3081_v7  ;;  %v3091_v40 = vadd.f32 %v2965_v11, %v852_v58  ;;  %v3093_v1 = vpop.eup %2154  ;;  %v3100_v49 = vmul.f32 0.5, %v843_v63 }
 0x30b   : > { %3465 = vst [vmem:[#allocation29_spill] sm:$0xff] %v3085_v35  ;;  %2174 = vrcp.f32 %v935_v0  ;;  %v922_v3 = vmul.f32 0.3275911, %v906_v34  ;;  %v1130_v14 = vsub.f32 0.0, %v906_v34  ;;  %v3096_v21 = vmul.f32 0.70710677, %v3085_v35  ;;  %v3098_v4 = vpop.eup %2156 }
 0x30c   : > { %3466 = vst [vmem:[#allocation30_spill] sm:$0xff] %v3091_v40  ;;  %3468 = vst [vmem:[#allocation32_spill] sm:$0xff] %v3100_v49  ;;  %v921_v12 = vmul.f32 0.3275911, %v905_v60  ;;  %v1129_v23 = vsub.f32 0.0, %v905_v60  ;;  %v3105_v29 = vpop.eup %2158  ;;  %2176 = vpow2.f32 %v1171_v8  ;;  %vm1215_vm2 = vcmp.ge.f32.partialorder %v2979_v33, 0.0 }
 0x30d   : > { %3467 = vst [vmem:[#allocation31_spill] sm:$0xff] %v3096_v21  ;;  %v3103_v24 = vmul.f32 0.70710677, %v3091_v40  ;;  %v938_v11 = vadd.f32 1.0, %v922_v3  ;;  %v1146_v58 = vmul.f32 %v1130_v14, %v906_v34  ;;  %v908_v30 = vand.u32 2147483647, %v3096_v21  ;;  %v3108_v31 = vpop.eup %2160 }
 0x30e   : > { %2178 = vpow2.f32 %v1169_v17  ;;  %v937_v39 = vadd.f32 1.0, %v921_v12  ;;  %v1145_v42 = vmul.f32 %v1129_v23, %v905_v60  ;;  %v3111_v56 = vpop.eup %2162  ;;  %v973_v60 = vmul.f32 1.0614054, %v3033_v43 }
 0x30f   : > { %3469 = vst [vmem:[#allocation33_spill] sm:$0xff] %v3103_v24  ;;  %v907_v55 = vand.u32 2147483647, %v3103_v24  ;;  %2180 = vrcp.f32 %v938_v11  ;;  %v1175_v63 = vmul.f32 1.442695, %v1146_v58  ;;  %v1132_v35 = vsub.f32 0.0, %v908_v30  ;;  %v3113_v46 = vpop.eup %2164 }
 0x310   : > { %v924_v0 = vmul.f32 0.3275911, %v908_v30  ;;  %2182 = vrcp.f32 %v937_v39  ;;  %v1173_v8 = vmul.f32 1.442695, %v1145_v42  ;;  %v974_v21 = vmul.f32 1.0614054, %v3018_v37 }
 0x311   : > { %v923_v34 = vmul.f32 0.3275911, %v907_v55  ;;  %v1131_v3 = vsub.f32 0.0, %v907_v55  ;;  %v3115_v14 = vpop.eup %2166  ;;  %2184 = vpow2.f32 %v1175_v63  ;;  %v1148_v12 = vmul.f32 %v1132_v35, %v908_v30 }
 0x312   : > { %v940_v17 = vadd.f32 1.0, %v924_v0  ;;  %v3118_v23 = vpop.eup %2168  ;;  %2186 = vpow2.f32 %v1173_v8  ;;  %v989_v42 = vadd.f32 -1.4531521, %v973_v60  ;;  %v975_v49 = vmul.f32 1.0614054, %v3053_v18 }
 0x313   : > { %3470 = vst [vmem:[#allocation34_spill] sm:$0xff] %v3118_v23  ;;  %v939_v11 = vadd.f32 1.0, %v923_v34  ;;  %v1147_v58 = vmul.f32 %v1131_v3, %v907_v55  ;;  %v3121_v40 = vpop.eup %2170  ;;  %v1179_v39 = vmul.f32 1.442695, %v1148_v12  ;;  %v990_v30 = vadd.f32 -1.4531521, %v974_v21 }
 0x314   : > { %3471 = vst [vmem:[#allocation35_spill] sm:$0xff] %v3121_v40  ;;  %2188 = vrcp.f32 %v940_v17  ;;  %v3124_v57 = vpop.eup %2172  ;;  %v976_v63 = vmul.f32 1.0614054, %v3050_v16  ;;  %v1005_v55 = vmul.f32 %v3033_v43, %v989_v42  ;;  %v991_v8 = vadd.f32 -1.4531521, %v975_v49 }
 0x315   : > { %2190 = vrcp.f32 %v939_v11  ;;  %v1177_v35 = vmul.f32 1.442695, %v1147_v58  ;;  %v3127_v0 = vpop.eup %2174  ;;  %v977_v34 = vmul.f32 1.0614054, %v3066_v54  ;;  %v1006_v3 = vmul.f32 %v3018_v37, %v990_v30 }
 0x316   : > { %2192 = vpow2.f32 %v1179_v39  ;;  %v992_v17 = vadd.f32 -1.4531521, %v976_v63  ;;  %v978_v12 = vmul.f32 1.0614054, %v3060_v38  ;;  %v3133_v60 = vpop.eup %2176  ;;  %v1021_v11 = vadd.f32 1.4214138, %v1005_v55 }
 0x317   : > { %2194 = vpow2.f32 %v1177_v35  ;;  %3472 = vst [vmem:[#allocation36_spill] sm:$0xff] %v3133_v60  ;;  %v1007_v21 = vmul.f32 %v3053_v18, %v991_v8  ;;  %v993_v58 = vadd.f32 -1.4531521, %v977_v34  ;;  %v979_v6 = vmul.f32 1.0614054, %v3105_v29 }
 0x318   : > { %v3137_v39 = vpop.eup %2178  ;;  %v1022_v42 = vadd.f32 1.4214138, %v1006_v3  ;;  %v1008_v49 = vmul.f32 %v3050_v16, %v992_v17  ;;  %v994_v24 = vadd.f32 -1.4531521, %v978_v12  ;;  %v980_v35 = vmul.f32 1.0614054, %v3098_v4 }
 0x319   : > { %3473 = vst [vmem:[#allocation37_spill] sm:$0xff] %v3137_v39  ;;  %v3141_v30 = vpop.eup %2180  ;;  %v1037_v63 = vmul.f32 %v3033_v43, %v1021_v11  ;;  %v1023_v5 = vadd.f32 1.4214138, %v1007_v21  ;;  %v1009_v55 = vmul.f32 %v3066_v54, %v993_v58  ;;  %v995_v20 = vadd.f32 -1.4531521, %v979_v6 }
 0x31a   : > { %v3145_v8 = vpop.eup %2182  ;;  %v1038_v34 = vmul.f32 %v3018_v37, %v1022_v42  ;;  %v1024_v28 = vadd.f32 1.4214138, %v1008_v49  ;;  %v1010_v3 = vmul.f32 %v3060_v38, %v994_v24  ;;  %v996_v60 = vadd.f32 -1.4531521, %v980_v35 }
 0x31b   : > { %v3149_v17 = vpop.eup %2184  ;;  %v1053_v12 = vadd.f32 -0.28449672, %v1037_v63  ;;  %v1039_v39 = vmul.f32 %v3053_v18, %v1023_v5  ;;  %v1025_v23 = vadd.f32 1.4214138, %v1009_v55  ;;  %v1011_v11 = vmul.f32 %v3105_v29, %v995_v20 }
 0x31c   : > { %3474 = vst [vmem:[#allocation38_spill] sm:$0xff] %v3149_v17  ;;  %v3153_v21 = vpop.eup %2186  ;;  %v1054_v58 = vadd.f32 -0.28449672, %v1038_v34  ;;  %v1040_v6 = vmul.f32 %v3050_v16, %v1024_v28  ;;  %v1026_v40 = vadd.f32 1.4214138, %v1010_v3  ;;  %v1012_v42 = vmul.f32 %v3098_v4, %v996_v60 }
 0x31d   : > { %3475 = vst [vmem:[#allocation39_spill] sm:$0xff] %v3153_v21  ;;  %v1069_v24 = vmul.f32 %v3033_v43, %v1053_v12  ;;  %v1055_v35 = vadd.f32 -0.28449672, %v1039_v39  ;;  %v1041_v63 = vmul.f32 %v3066_v54, %v1025_v23  ;;  %v1027_v17 = vadd.f32 1.4214138, %v1011_v11 }
 0x31e   : > { %v3157_v49 = vpop.eup %2188  ;;  %v1070_v20 = vmul.f32 %v3018_v37, %v1054_v58  ;;  %v1056_v55 = vadd.f32 -0.28449672, %v1040_v6  ;;  %v1042_v34 = vmul.f32 %v3060_v38, %v1026_v40  ;;  %v1028_v21 = vadd.f32 1.4214138, %v1012_v42 }
 0x31f   : > { %v3161_v5 = vpop.eup %2190  ;;  %v1085_v3 = vadd.f32 0.2548296, %v1069_v24  ;;  %v1071_v60 = vmul.f32 %v3053_v18, %v1055_v35  ;;  %v1057_v7 = vadd.f32 -0.28449672, %v1041_v63  ;;  %v1043_v12 = vmul.f32 %v3105_v29, %v1027_v17 }
 0x320   : > { %v3165_v28 = vpop.eup %2192  ;;  %v1086_v23 = vadd.f32 0.2548296, %v1070_v20  ;;  %v1072_v11 = vmul.f32 %v3050_v16, %v1056_v55  ;;  %v1058_v58 = vadd.f32 -0.28449672, %v1042_v34  ;;  %v1044_v6 = vmul.f32 %v3098_v4, %v1028_v21 }
 0x321   : > { %3476 = vst [vmem:[#allocation40_spill] sm:$0xff] %v3165_v28  ;;  %v3169_v39 = vpop.eup %2194  ;;  %v1101_v40 = vmul.f32 %v3033_v43, %v1085_v3  ;;  %v1087_v42 = vadd.f32 0.2548296, %v1071_v60  ;;  %v1073_v24 = vmul.f32 %v3066_v54, %v1057_v7  ;;  %v1059_v35 = vadd.f32 -0.28449672, %v1043_v12 }
 0x322   : > { %v1102_v17 = vmul.f32 %v3018_v37, %v1086_v23  ;;  %v1088_v63 = vadd.f32 0.2548296, %v1072_v11  ;;  %v1074_v20 = vmul.f32 %v3060_v38, %v1058_v58  ;;  %v1060_v28 = vadd.f32 -0.28449672, %v1044_v6 }
 0x323   : > { %vm1216_vm3 = vcmp.ge.f32.partialorder %v2977_v32, 0.0  ;;  %v1181_v21 = vmul.f32 %v3046_v59, %v1101_v40  ;;  %v1103_v55 = vmul.f32 %v3053_v18, %v1087_v42  ;;  %v1089_v34 = vadd.f32 0.2548296, %v1073_v24 }
 0x324   : > { %v1075_v43 = vmul.f32 %v3105_v29, %v1059_v35  ;;  %vm1217_vm4 = vcmp.ge.f32.partialorder %v2993_v51, 0.0  ;;  %v1182_v7 = vmul.f32 %v3041_v2, %v1102_v17  ;;  %v1104_v3 = vmul.f32 %v3050_v16, %v1088_v63 }
 0x325   : > { %v1090_v37 = vadd.f32 0.2548296, %v1074_v20  ;;  %v1076_v60 = vmul.f32 %v3098_v4, %v1060_v28  ;;  %vm1218_vm5 = vcmp.ge.f32.partialorder %v2987_v61, 0.0  ;;  %v1197_v12 = vsub.f32 1.0, %v1181_v21 }
 0x326   : > { %v1183_v23 = vmul.f32 %v3058_v53, %v1103_v55  ;;  %v1105_v59 = vmul.f32 %v3066_v54, %v1089_v34  ;;  %v1091_v18 = vadd.f32 0.2548296, %v1075_v43  ;;  %vm1219_vm6 = vcmp.ge.f32.partialorder %v3001_v27, 0.0 }
 0x327   : > { %v1198_v11 = vsub.f32 1.0, %v1182_v7  ;;  %v1184_v58 = vmul.f32 %v3056_v19, %v1104_v3  ;;  %v1106_v2 = vmul.f32 %v3060_v38, %v1090_v37  ;;  %v1092_v6 = vadd.f32 0.2548296, %v1076_v60 }
 0x328   : > { %v1229_v16 = vsub.f32 0.0, %v1197_v12  ;;  %v1199_v40 = vsub.f32 1.0, %v1183_v23  ;;  %v1185_v28 = vmul.f32 %v3093_v1, %v1105_v59  ;;  %v1107_v42 = vmul.f32 %v3105_v29, %v1091_v18 }
 0x329   : > { %v1230_v24 = vsub.f32 0.0, %v1198_v11  ;;  %v1200_v35 = vsub.f32 1.0, %v1184_v58  ;;  %v1186_v53 = vmul.f32 %v3087_v9, %v1106_v2  ;;  %v1108_v54 = vmul.f32 %v3098_v4, %v1092_v6 }
 0x32a   : > { %v1245_v17 = vsel %vm1213_vm0, %v1197_v12, %v1229_v16  ;;  %v1231_v63 = vsub.f32 0.0, %v1199_v40  ;;  %v1201_v19 = vsub.f32 1.0, %v1185_v28  ;;  %v1187_v38 = vmul.f32 %v3111_v56, %v1107_v42 }
 0x32b   : > { %v1261_v20 = vadd.f32 1.0, %v1245_v17  ;;  %v1246_v21 = vsel %vm1214_vm1, %v1198_v11, %v1230_v24  ;;  %v1232_v1 = vsub.f32 0.0, %v1200_v35  ;;  %v1202_v55 = vsub.f32 1.0, %v1186_v53 }
 0x32c   : > { %vm1220_vm7 = vcmp.ge.f32.partialorder %v2999_v13, 0.0  ;;  %v1262_v29 = vadd.f32 1.0, %v1246_v21  ;;  %v1247_v9 = vsel %vm1215_vm2, %v1199_v40, %v1231_v63  ;;  %v1233_v4 = vsub.f32 0.0, %v1201_v19 }
 0x32d   : > { %v1203_v34 = vsub.f32 1.0, %v1187_v38  ;;  %v1277_v25 = vmul.f32 %v1261_v20, %v2989_v44  ;;  %v1263_v43 = vadd.f32 1.0, %v1247_v9  ;;  %v1248_v56 = vsel %vm1216_vm3, %v1200_v35, %v1232_v1 }
 0x32e   : > { %v1234_v7 = vsub.f32 0.0, %v1202_v55  ;;  %v1278_v45 = vmul.f32 %v1262_v29, %v2984_v50  ;;  %v1264_v3 = vadd.f32 1.0, %v1248_v56  ;;  %v1249_v37 = vsel %vm1217_vm4, %v1201_v19, %v1233_v4 }
 0x32f   : > { %v1235_v60 = vsub.f32 0.0, %v1203_v34  ;;  %1894 = vmatprep.mubr.f32.mxu1 %v1277_v25  ;;  %v1279_v33 = vmul.f32 %v1263_v43, %v3004_v15  ;;  %v1265_v12 = vadd.f32 1.0, %v1249_v37  ;;  %v1188_v44 = vmul.f32 %v3108_v31, %v1108_v54 }
 0x330   : > { %v1250_v23 = vsel %vm1218_vm5, %v1202_v55, %v1234_v7  ;;  %1895 = vmatmul.mubr.f32.vlgmr.msra.gmra.mrb[0].mxu1 %v1278_v45  ;;  %v1280_v32 = vmul.f32 %v1264_v3, %v2991_v62  ;;  %v981_v51 = vmul.f32 1.0614054, %v3115_v14  ;;  %v982_v58 = vmul.f32 1.0614054, %v3113_v46 }
 0x331   : > { %v1266_v59 = vadd.f32 1.0, %v1250_v23  ;;  %v1251_v50 = vsel %vm1219_vm6, %v1203_v34, %v1235_v60  ;;  %1897 = vmatprep.mubr.f32.mxu1 %v1279_v33  ;;  %v1281_v18 = vmul.f32 %v1265_v12, %v3009_v26  ;;  %v1204_v15 = vsub.f32 1.0, %v1188_v44 }
 0x332   : > { %v1267_v11 = vadd.f32 1.0, %v1251_v50  ;;  %v997_v2 = vadd.f32 -1.4531521, %v981_v51  ;;  %v983_v31 = vmul.f32 1.0614054, %v3127_v0  ;;  %vm1221_vm8 = vcmp.ge.f32.partialorder %v3031_v48, 0.0 }
 0x333   : > { %v1282_v61 = vmul.f32 %v1266_v59, %v3007_v22  ;;  %v984_v62 = vmul.f32 1.0614054, %v3124_v57  ;;  %v1236_v27 = vsub.f32 0.0, %v1204_v15  ;;  %v998_v16 = vadd.f32 -1.4531521, %v982_v58 }
 0x334   : > { %v1283_v6 = vmul.f32 %v1267_v11, %v3028_v47  ;;  %v985_v40 = vmul.f32 1.0614054, %v3145_v8  ;;  %1898 = vmatmul.mubr.f32.gmra.mrb[2].mxu1 %v1280_v32  ;;  %v1013_v26 = vmul.f32 %v3115_v14, %v997_v2  ;;  %v999_v28 = vadd.f32 -1.4531521, %v983_v31 }
 0x335   : > { %v1000_v42 = vadd.f32 -1.4531521, %v984_v62  ;;  %v986_v24 = vmul.f32 1.0614054, %v3141_v30  ;;  %1900 = vmatprep.mubr.f32.mxu1 %v1281_v18  ;;  %v1252_v22 = vsel %vm1220_vm7, %v1204_v15, %v1236_v27  ;;  %v1014_v35 = vmul.f32 %v3113_v46, %v998_v16 }
 0x336   : > { %v1001_v53 = vadd.f32 -1.4531521, %v985_v40  ;;  %v987_v47 = vmul.f32 1.0614054, %v3161_v5  ;;  %v1268_v54 = vadd.f32 1.0, %v1252_v22  ;;  %v1015_v63 = vmul.f32 %v3127_v0, %v999_v28 }
 0x337   : > { %v1029_v17 = vadd.f32 1.4214138, %v1013_v26  ;;  %v1016_v19 = vmul.f32 %v3124_v57, %v1000_v42  ;;  %v1030_v38 = vadd.f32 1.4214138, %v1014_v35  ;;  %v1002_v21 = vadd.f32 -1.4531521, %v986_v24 }
 0x338   : > { %v1017_v20 = vmul.f32 %v3145_v8, %v1001_v53  ;;  %v1003_v1 = vadd.f32 -1.4531521, %v987_v47  ;;  %1901 = vmatmul.mubr.f32.gmra.mrb[4].mxu1 %v1282_v61  ;;  %v1284_v13 = vmul.f32 %v1268_v54, %v3023_v41  ;;  %v1031_v29 = vadd.f32 1.4214138, %v1015_v63  ;;  %v3477_v35 = vld [vmem:[#allocation28_spill] sm:$0xff]  ;;  %v3478_v53 = vld [vmem:[#allocation35_spill] sm:$0xff] }
 0x339   : > { %v1045_v55 = vmul.f32 %v3115_v14, %v1029_v17  ;;  %v1032_v9 = vadd.f32 1.4214138, %v1016_v19  ;;  %1903 = vmatprep.mubr.f32.mxu1 %v1283_v6  ;;  %v1046_v4 = vmul.f32 %v3113_v46, %v1030_v38  ;;  %v1018_v25 = vmul.f32 %v3141_v30, %v1002_v21  ;;  %v3479_v63 = vld [vmem:[#allocation34_spill] sm:$0xff] }
 0x33a   : > { %v1033_v34 = vadd.f32 1.4214138, %v1017_v20  ;;  %v1019_v43 = vmul.f32 %v3161_v5, %v1003_v1  ;;  %v1047_v7 = vmul.f32 %v3127_v0, %v1031_v29  ;;  %v988_v3 = vmul.f32 1.0614054, %v3157_v49  ;;  %v3480_v1 = vld [vmem:[#allocation37_spill] sm:$0xff] }
 0x33b   : > { %v1061_v56 = vadd.f32 -0.28449672, %v1045_v55  ;;  %v1048_v45 = vmul.f32 %v3124_v57, %v1032_v9  ;;  %v1062_v41 = vadd.f32 -0.28449672, %v1046_v4  ;;  %v1034_v60 = vadd.f32 1.4214138, %v1018_v25 }
 0x33c   : > { %v1049_v37 = vmul.f32 %v3145_v8, %v1033_v34  ;;  %v1035_v33 = vadd.f32 1.4214138, %v1019_v43  ;;  %1904 = vmatmul.mubr.f32.gmra.mrb[6].mxu1 %v1284_v13  ;;  %v1063_v23 = vadd.f32 -0.28449672, %v1047_v7  ;;  %v1004_v32 = vadd.f32 -1.4531521, %v988_v3 }
 0x33d   : > { %v1077_v12 = vmul.f32 %v3115_v14, %v1061_v56  ;;  %v1064_v44 = vadd.f32 -0.28449672, %v1048_v45  ;;  %v1078_v59 = vmul.f32 %v3113_v46, %v1062_v41  ;;  %v1050_v51 = vmul.f32 %v3141_v30, %v1034_v60  ;;  %v3481_v55 = vld [vmem:[#allocation36_spill] sm:$0xff]  ;;  %v3482_v34 = vld [vmem:[#allocation39_spill] sm:$0xff]  ;;  %v3483_v41 = vld [vmem:[#allocation38_spill] sm:$0xff] }
 0x33e   : > { %v1065_v50 = vadd.f32 -0.28449672, %v1049_v37  ;;  %v1051_v18 = vmul.f32 %v3161_v5, %v1035_v33  ;;  %v1079_v15 = vmul.f32 %v3127_v0, %v1063_v23  ;;  %v1020_v61 = vmul.f32 %v3157_v49, %v1004_v32 }
 0x33f   : > { %v1093_v11 = vadd.f32 0.2548296, %v1077_v12  ;;  %v1080_v58 = vmul.f32 %v3124_v57, %v1064_v44  ;;  %v1094_v2 = vadd.f32 0.2548296, %v1078_v59  ;;  %v1066_v62 = vadd.f32 -0.28449672, %v1050_v51 }
 0x340   : > { %v1081_v31 = vmul.f32 %v3145_v8, %v1065_v50  ;;  %v1067_v6 = vadd.f32 -0.28449672, %v1051_v18  ;;  %vm1222_vm9 = vcmp.ge.f32.partialorder %v3026_v36, 0.0  ;;  %v1095_v16 = vadd.f32 0.2548296, %v1079_v15 }
 0x341   : > { %v1109_v27 = vmul.f32 %v3115_v14, %v1093_v11  ;;  %v1096_v40 = vadd.f32 0.2548296, %v1080_v58  ;;  %v1036_v26 = vadd.f32 1.4214138, %v1020_v61  ;;  %vm1224_vm10 = vcmp.ge.f32.partialorder %v3044_v52, 0.0  ;;  %v3484_v11 = vld [vmem:[#allocation26_spill] sm:$0xff] }
 0x342   : > { %vm1223_vm11 = vcmp.ge.f32.partialorder %v3048_v10, 0.0  ;;  %v1110_v28 = vmul.f32 %v3113_v46, %v1094_v2  ;;  %v1097_v42 = vadd.f32 0.2548296, %v1081_v31  ;;  %v1082_v24 = vmul.f32 %v3141_v30, %v1066_v62  ;;  %v3485_v2 = vld [vmem:[#allocation24_spill] sm:$0xff]  ;;  %v3487_v10 = vld [vmem:[#allocation33_spill] sm:$0xff]  ;;  %v3488_v52 = vld [vmem:[#allocation27_spill] sm:$0xff] }
 0x343   : > { %v1083_v22 = vmul.f32 %v3161_v5, %v1067_v6  ;;  %vm1225_vm12 = vcmp.ge.f32.partialorder %v3477_v35, 0.0  ;;  %v1189_v47 = vmul.f32 %v3478_v53, %v1109_v27  ;;  %v1111_v14 = vmul.f32 %v3127_v0, %v1095_v16  ;;  %v3486_v27 = vld [vmem:[#allocation25_spill] sm:$0xff] }
 0x344   : > { %v1112_v54 = vmul.f32 %v3124_v57, %v1096_v40  ;;  %v1052_v17 = vmul.f32 %v3157_v49, %v1036_v26  ;;  %v1190_v19 = vmul.f32 %v3479_v63, %v1110_v28  ;;  %v1113_v38 = vmul.f32 %v3145_v8, %v1097_v42  ;;  %v3489_v26 = vld [vmem:[#allocation22_spill] sm:$0xff] }
 0x345   : > { %v1098_v46 = vadd.f32 0.2548296, %v1082_v24  ;;  %v1099_v20 = vadd.f32 0.2548296, %v1083_v22  ;;  %v1205_v21 = vsub.f32 1.0, %v1189_v47  ;;  %v1191_v13 = vmul.f32 %v3480_v1, %v1111_v14  ;;  %v3490_v22 = vld [vmem:[#allocation32_spill] sm:$0xff] }
 0x346   : > { %v1192_v29 = vmul.f32 %v3481_v55, %v1112_v54  ;;  %v1068_v9 = vadd.f32 -0.28449672, %v1052_v17  ;;  %v1206_v4 = vsub.f32 1.0, %v1190_v19  ;;  %v1193_v25 = vmul.f32 %v3482_v34, %v1113_v38  ;;  %v3491_v47 = vld [vmem:[#allocation40_spill] sm:$0xff]  ;;  %v3492_v63 = vld [vmem:[#allocation30_spill] sm:$0xff]  ;;  %v3494_v1 = vld [vmem:[#allocation31_spill] sm:$0xff] }
 0x347   : > { %v1114_v0 = vmul.f32 %v3141_v30, %v1098_v46  ;;  %v1115_v57 = vmul.f32 %v3161_v5, %v1099_v20  ;;  %v1237_v43 = vsub.f32 0.0, %v1205_v21  ;;  %v1207_v56 = vsub.f32 1.0, %v1191_v13  ;;  %v3493_v46 = vld [vmem:[#allocation23_spill] sm:$0xff] }
 0x348   : > { %v1208_v7 = vsub.f32 1.0, %v1192_v29  ;;  %v1084_v8 = vmul.f32 %v3157_v49, %v1068_v9  ;;  %v1238_v45 = vsub.f32 0.0, %v1206_v4  ;;  %v1209_v3 = vsub.f32 1.0, %v1193_v25  ;;  %v3495_v29 = vld [vmem:[#allocation29_spill] sm:$0xff]  ;;  %v1294_v25 = vld [vmem:[#allocation3 + $0x8] sm:$0xff] }
 0x349   : > { %v1194_v37 = vmul.f32 %v3483_v41, %v1114_v0  ;;  %v1195_v60 = vmul.f32 %v3169_v39, %v1115_v57  ;;  %v1253_v33 = vsel %vm1221_vm8, %v1205_v21, %v1237_v43  ;;  %v1239_v12 = vsub.f32 0.0, %v1207_v56  ;;  %v1293_v0 = vld [vmem:[#allocation3] sm:$0xff] }
 0x34a   : > { %v1240_v23 = vsub.f32 0.0, %v1208_v7  ;;  %v1100_v44 = vadd.f32 0.2548296, %v1084_v8  ;;  %v1269_v30 = vadd.f32 1.0, %v1253_v33  ;;  %v1254_v5 = vsel %vm1222_vm9, %v1206_v4, %v1238_v45  ;;  %v1296_v8 = vld [vmem:[#allocation3 + $0x18] sm:$0xff]  ;;  %v1295_v45 = vld [vmem:[#allocation3 + $0x10] sm:$0xff] }
 0x34b   : > { %v1241_v32 = vsub.f32 0.0, %v1209_v3  ;;  %v1210_v59 = vsub.f32 1.0, %v1194_v37  ;;  %v1270_v50 = vadd.f32 1.0, %v1254_v5  ;;  %v1255_v51 = vsel %vm1223_vm11, %v1207_v56, %v1239_v12  ;;  %v1298_v33 = vld [vmem:[#allocation3 + $0x28] sm:$0xff]  ;;  %v1297_v12 = vld [vmem:[#allocation3 + $0x20] sm:$0xff] }
 0x34c   : > { %v1256_v18 = vsel %vm1224_vm10, %v1208_v7, %v1240_v23  ;;  %v1211_v39 = vsub.f32 1.0, %v1195_v60  ;;  %v1285_v48 = vmul.f32 %v1269_v30, %v3484_v11  ;;  %v1271_v15 = vadd.f32 1.0, %v1255_v51  ;;  %v1302_v11 = vld [vmem:[#allocation3 + $0x48] sm:$0xff] }
 0x34d   : > { %v1272_v58 = vadd.f32 1.0, %v1256_v18  ;;  %v1257_v61 = vsel %vm1225_vm12, %v1209_v3, %v1241_v32  ;;  %v1286_v36 = vmul.f32 %v1270_v50, %v3485_v2  ;;  %v1242_v62 = vsub.f32 0.0, %v1210_v59  ;;  %v1300_v32 = vld [vmem:[#allocation3 + $0x38] sm:$0xff] }
 0x34e   : > { %v1273_v31 = vadd.f32 1.0, %v1257_v61  ;;  %v1243_v6 = vsub.f32 0.0, %v1211_v39  ;;  %vm1226_vm13 = vcmp.ge.f32.partialorder %v3486_v27, 0.0  ;;  %vm1227_vm14 = vcmp.ge.f32.partialorder %v3487_v10, 0.0  ;;  %1906 = vmatprep.mubr.f32.mxu1 %v1285_v48  ;;  %v1301_v48 = vld [vmem:[#allocation3 + $0x40] sm:$0xff] }
 0x34f   : > { %v1287_v16 = vmul.f32 %v1271_v15, %v3488_v52  ;;  %v1116_v40 = vmul.f32 %v3157_v49, %v1100_v44  ;;  %v872_v28 = vmul.f32 0.5, %v3489_v26  ;;  %1907 = vmatmul.mubr.f32.gmra.mrb[8].mxu1 %v1286_v36  ;;  %v1258_v42 = vsel %vm1226_vm13, %v1210_v59, %v1242_v62  ;;  %v1299_v59 = vld [vmem:[#allocation3 + $0x30] sm:$0xff]  ;;  %v1304_v36 = vld [vmem:[#allocation3 + $0x58] sm:$0xff]  ;;  %v1306_v52 = vld [vmem:[#allocation3 + $0x68] sm:$0xff] }
 0x350   : > { %v1259_v24 = vsel %vm1227_vm14, %v1211_v39, %v1243_v6  ;;  %v1289_v35 = vmul.f32 %v1273_v31, %v3490_v22  ;;  %v1274_v17 = vadd.f32 1.0, %v1258_v42  ;;  %v875_v19 = vmul.f32 0.5, %v3492_v63  ;;  %v1303_v31 = vld [vmem:[#allocation3 + $0x50] sm:$0xff] }
 0x351   : > { %1909 = vmatprep.mubr.f32.mxu1 %v1287_v16  ;;  %v1275_v53 = vadd.f32 1.0, %v1259_v24  ;;  %v1196_v14 = vmul.f32 %v3491_v47, %v1116_v40  ;;  %v1288_v54 = vmul.f32 %v1272_v58, %v872_v28  ;;  %v874_v20 = vmul.f32 0.5, %v3493_v46  ;;  %v1305_v16 = vld [vmem:[#allocation3 + $0x60] sm:$0xff]  ;;  %v1308_v24 = vld [vmem:[#allocation3 + $0x78] sm:$0xff]  ;;  %v1307_v22 = vld [vmem:[#allocation3 + $0x70] sm:$0xff] }
 0x352   : > { %vm1228_vm15 = vcmp.ge.f32.partialorder %v3494_v1, 0.0  ;;  %v876_v9 = vmul.f32 0.5, %v3495_v29 }
 0x353   : > { %v1212_v38 = vsub.f32 1.0, %v1196_v14  ;;  %1910 = vmatmul.mubr.f32.gmra.mrb[10].mxu1 %v1288_v54  ;;  %v1291_v49 = vmul.f32 %v1275_v53, %v875_v19  ;;  %v1290_v13 = vmul.f32 %v1274_v17, %v874_v20  ;;  %v1733_v17 = vld [vmem:[%s3496_s16] ss:$0 sm:$0xff] (!%p1732_p2) }
 0x354   : > { %1912 = vmatprep.mubr.f32.mxu1 %v1289_v35 }
 0x355   : > { %v1244_v21 = vsub.f32 0.0, %v1212_v38 }
 0x357   : > { %v1260_v55 = vsel %vm1228_vm15, %v1212_v38, %v1244_v21  ;;  %1913 = vmatmul.mubr.f32.gmra.mrb[12].mxu1 %v1290_v13 }
 0x358   : > { %v1276_v4 = vadd.f32 1.0, %v1260_v55  ;;  %1915 = vmatprep.mubr.f32.mxu1 %v1291_v49 }
 0x35a   : > { %v1292_v34 = vmul.f32 %v1276_v4, %v876_v9 }
 0x35c   : > { %1916 = vmatmul.mubr.f32.gmra.mrb[14].mxu1 %v1292_v34 }
 0x403   : > { %v1896_v57 = vpop.f32.mrb[0].mxu1 }
 0x404   : > { %v1471_v43 = vadd.f32 %v1896_v57, %v1294_v25  ;;  %v1391_v56 = vpop.f32.mrb[1].mxu1 }
 0x405   : > { %v1470_v7 = vadd.f32 %v1391_v56, %v1293_v0 }
 0x406   : > { %1487 = vst [vmem:[#allocation3 + $0x8] sm:$0xff] %v1471_v43 }
 0x407   : > { %1486 = vst [vmem:[#allocation3] sm:$0xff] %v1470_v7  ;;  %v1899_v3 = vpop.f32.mrb[2].mxu1 }
 0x408   : > { %v1473_v41 = vadd.f32 %v1899_v3, %v1296_v8  ;;  %v1401_v37 = vpop.f32.mrb[3].mxu1 }
 0x409   : > { %v1472_v60 = vadd.f32 %v1401_v37, %v1295_v45 }
 0x40a   : > { %1489 = vst [vmem:[#allocation3 + $0x18] sm:$0xff] %v1473_v41 }
 0x40b   : > { %1488 = vst [vmem:[#allocation3 + $0x10] sm:$0xff] %v1472_v60  ;;  %v1902_v23 = vpop.f32.mrb[4].mxu1 }
 0x40c   : > { %v1475_v44 = vadd.f32 %v1902_v23, %v1298_v33  ;;  %v1411_v30 = vpop.f32.mrb[5].mxu1 }
 0x40d   : > { %v1474_v5 = vadd.f32 %v1411_v30, %v1297_v12  ;;  %v1507_v63 = vld [vmem:[#allocation3 + $0x8] sm:$0xff] (!%p1732_p2) }
 0x40e   : > { %1491 = vst [vmem:[#allocation3 + $0x28] sm:$0xff] %v1475_v44  ;;  %v1506_v54 = vld [vmem:[#allocation3] sm:$0xff] (!%p1732_p2)  ;;  %v1530_v38 = vadd.f32 (!%p1732_p2), %v1733_v17, %v1507_v63 }
 0x40f   : > { %1490 = vst [vmem:[#allocation3 + $0x20] sm:$0xff] %v1474_v5  ;;  %v1905_v50 = vpop.f32.mrb[6].mxu1  ;;  %v1529_v19 = vadd.f32 (!%p1732_p2), %v1733_v17, %v1506_v54 }
 0x410   : > { %v1477_v51 = vadd.f32 %v1905_v50, %v1300_v32  ;;  %v1421_v18 = vpop.f32.mrb[7].mxu1  ;;  %1546 = vst [vmem:[%s2767_s29 + $0x8] sm:$0xff] (!%p1732_p2), %v1530_v38 }
 0x411   : > { %v1476_v39 = vadd.f32 %v1421_v18, %v1299_v59  ;;  %v1509_v20 = vld [vmem:[#allocation3 + $0x18] sm:$0xff] (!%p1732_p2)  ;;  %1545 = vst [vmem:[%s2767_s29] sm:$0xff] (!%p1732_p2), %v1529_v19 }
 0x412   : > { %1493 = vst [vmem:[#allocation3 + $0x38] sm:$0xff] %v1477_v51  ;;  %v1508_v46 = vld [vmem:[#allocation3 + $0x10] sm:$0xff] (!%p1732_p2)  ;;  %v1532_v1 = vadd.f32 (!%p1732_p2), %v1733_v17, %v1509_v20 }
 0x413   : > { %1492 = vst [vmem:[#allocation3 + $0x30] sm:$0xff] %v1476_v39  ;;  %v1531_v21 = vadd.f32 (!%p1732_p2), %v1733_v17, %v1508_v46 }
 0x414   : > { %1548 = vst [vmem:[%s2767_s29 + $0x18] sm:$0xff] (!%p1732_p2), %v1532_v1 }
 0x415   : > { %v1511_v55 = vld [vmem:[#allocation3 + $0x28] sm:$0xff] (!%p1732_p2)  ;;  %1547 = vst [vmem:[%s2767_s29 + $0x10] sm:$0xff] (!%p1732_p2), %v1531_v21 }
 0x416   : > { %v1510_v49 = vld [vmem:[#allocation3 + $0x20] sm:$0xff] (!%p1732_p2)  ;;  %v1534_v4 = vadd.f32 (!%p1732_p2), %v1733_v17, %v1511_v55 }
 0x417   : > { %v1533_v13 = vadd.f32 (!%p1732_p2), %v1733_v17, %v1510_v49 }
 0x418   : > { %1550 = vst [vmem:[%s2767_s29 + $0x28] sm:$0xff] (!%p1732_p2), %v1534_v4 }
 0x419   : > { %v1513_v9 = vld [vmem:[#allocation3 + $0x38] sm:$0xff] (!%p1732_p2)  ;;  %1549 = vst [vmem:[%s2767_s29 + $0x20] sm:$0xff] (!%p1732_p2), %v1533_v13 }
 0x41a   : > { %v1512_v29 = vld [vmem:[#allocation3 + $0x30] sm:$0xff] (!%p1732_p2)  ;;  %v1536_v25 = vadd.f32 (!%p1732_p2), %v1733_v17, %v1513_v9 }
 0x41b   : > { %v1535_v34 = vadd.f32 (!%p1732_p2), %v1733_v17, %v1512_v29 }
 0x41c   : > { %1552 = vst [vmem:[%s2767_s29 + $0x38] sm:$0xff] (!%p1732_p2), %v1536_v25 }
 0x41d   : > { %1551 = vst [vmem:[%s2767_s29 + $0x30] sm:$0xff] (!%p1732_p2), %v1535_v34 }
 0x422   : > { %v1908_v15 = vpop.f32.mrb[8].mxu1 }
 0x423   : > { %v1479_v58 = vadd.f32 %v1908_v15, %v1302_v11  ;;  %v1431_v61 = vpop.f32.mrb[9].mxu1 }
 0x424   : > { %v1478_v2 = vadd.f32 %v1431_v61, %v1301_v48 }
 0x425   : > { %1495 = vst [vmem:[#allocation3 + $0x48] sm:$0xff] %v1479_v58 }
 0x426   : > { %1494 = vst [vmem:[#allocation3 + $0x40] sm:$0xff] %v1478_v2  ;;  %v1911_v62 = vpop.f32.mrb[10].mxu1 }
 0x427   : > { %v1481_v6 = vadd.f32 %v1911_v62, %v1304_v36  ;;  %v1441_v27 = vpop.f32.mrb[11].mxu1 }
 0x428   : > { %v1480_v10 = vadd.f32 %v1441_v27, %v1303_v31 }
 0x429   : > { %1497 = vst [vmem:[#allocation3 + $0x58] sm:$0xff] %v1481_v6 }
 0x42a   : > { %1496 = vst [vmem:[#allocation3 + $0x50] sm:$0xff] %v1480_v10  ;;  %v1914_v40 = vpop.f32.mrb[12].mxu1 }
 0x42b   : > { %v1483_v26 = vadd.f32 %v1914_v40, %v1306_v52  ;;  %v1451_v28 = vpop.f32.mrb[13].mxu1 }
 0x42c   : > { %v1482_v42 = vadd.f32 %v1451_v28, %v1305_v16  ;;  %v1515_v57 = vld [vmem:[#allocation3 + $0x48] sm:$0xff] (!%p1732_p2) }
 0x42d   : > { %1499 = vst [vmem:[#allocation3 + $0x68] sm:$0xff] %v1483_v26  ;;  %1505 = sbr.rel (%p1732_p2) target bundleno = 1086 (0x43e), region = 68  ;;  %v1514_v0 = vld [vmem:[#allocation3 + $0x40] sm:$0xff] (!%p1732_p2)  ;;  %v1538_v7 = vadd.f32 (!%p1732_p2), %v1733_v17, %v1515_v57 }
 0x42e   : > { %1498 = vst [vmem:[#allocation3 + $0x60] sm:$0xff] %v1482_v42  ;;  %v1537_v56 = vadd.f32 (!%p1732_p2), %v1733_v17, %v1514_v0 }
 0x42f   : > { %v1917_v35 = vpop.f32.mrb[14].mxu1  ;;  %1554 = vst [vmem:[%s2767_s29 + $0x48] sm:$0xff] (!%p1732_p2), %v1538_v7 }
 0x430   : > { %v1485_v53 = vadd.f32 %v1917_v35, %v1308_v24  ;;  %v1461_v47 = vpop.f32.mrb[15].mxu1  ;;  %v1517_v45 = vld [vmem:[#allocation3 + $0x58] sm:$0xff] (!%p1732_p2)  ;;  %1553 = vst [vmem:[%s2767_s29 + $0x40] sm:$0xff] (!%p1732_p2), %v1537_v56 }
 0x431   : > { %v1484_v14 = vadd.f32 %v1461_v47, %v1307_v22  ;;  %v1516_v43 = vld [vmem:[#allocation3 + $0x50] sm:$0xff] (!%p1732_p2)  ;;  %v1540_v37 = vadd.f32 (!%p1732_p2), %v1733_v17, %v1517_v45 }
 0x432   : > { %1501 = vst [vmem:[#allocation3 + $0x78] sm:$0xff] %v1485_v53  ;;  %v1539_v8 = vadd.f32 (!%p1732_p2), %v1733_v17, %v1516_v43 }
 0x433   : > { %1500 = vst [vmem:[#allocation3 + $0x70] sm:$0xff] %v1484_v14  ;;  %1556 = vst [vmem:[%s2767_s29 + $0x58] sm:$0xff] (!%p1732_p2), %v1540_v37 }
 0x434   : > { %v1519_v41 = vld [vmem:[#allocation3 + $0x68] sm:$0xff]  ;;  %1555 = vst [vmem:[%s2767_s29 + $0x50] sm:$0xff] %v1539_v8 }
 0x435   : > { %v1518_v3 = vld [vmem:[#allocation3 + $0x60] sm:$0xff]  ;;  %v1542_v33 = vadd.f32 %v1733_v17, %v1519_v41 }
 0x436   : > { %v1541_v60 = vadd.f32 %v1733_v17, %v1518_v3 }
 0x437   : > { %1558 = vst [vmem:[%s2767_s29 + $0x68] sm:$0xff] %v1542_v33 }
 0x438   : > { %1557 = vst [vmem:[%s2767_s29 + $0x60] sm:$0xff] %v1541_v60 }
 0x439   : > { %v1521_v23 = vld [vmem:[#allocation3 + $0x78] sm:$0xff] }
 0x43a   : > { %v1520_v12 = vld [vmem:[#allocation3 + $0x70] sm:$0xff]  ;;  %v1544_v30 = vadd.f32 %v1733_v17, %v1521_v23 }
 0x43b   : > { %v1543_v44 = vadd.f32 %v1733_v17, %v1520_v12 }
 0x43c   : > { %1560 = vst [vmem:[%s2767_s29 + $0x78] sm:$0xff] %v1544_v30 }
 0x43d   : > { %1559 = vst [vmem:[%s2767_s29 + $0x70] sm:$0xff] %v1543_v44 }
 0x43e PF: > { %s3497_s30 = sld [smem:[#allocation16_spill]]  ;;  %s1575_s12 = sshll.u32 %s2767_s29, 4  ;;  %s3326_s12 = int_to_ptr.vmem [resolvable:$true] %s1575_s12 }
 0x43f   : > { %s3498_s13 = sld [smem:[#allocation45_spill]]  ;;  %s1562_s18 = scalar_lea.sflag [#allocation6], %s2739_s3 }
 0x440   : > { %s2286_s23 = scalar_lea.vmem %s3326_s12, 2048  ;;  %p3499_p11 = scmp.ne.s32.totalorder %s3444_s21, 0 }
 0x441   : > { %p2287_p13 = scmp.ne.s32.totalorder %s3326_s12, %s2286_s23  ;;  %s2421_s2 = smov [#allocation10]  }
 0x442   : > { %s2290_s26 = sshll.u32 %s2421_s2, 4  ;;  %s2291_s26 = int_to_ptr.vmem [resolvable:$false] %s2290_s26 }
 0x443   : > { %p2288_p6 = pnand %p2287_p13, %p3499_p11  ;;  %s2292_s24 = scalar_lea.vmem %s2291_s26, 4096 }
 0x444   : > { %s1741_s8 = sshll.u32 %s3497_s30, 11  ;;  %p2293_p1 = scmp.lt.s32.totalorder %s3326_s12, %s2291_s26 }
 0x445   : > { %s3323_s20 = scalar_lea.hbm %s3498_s13, %s1741_s8  ;;  %p2289_p5 = pneg %p2288_p6 }
 0x446   : > { %p2294_p0 = scmp.lt.s32.totalorder %s2292_s24, %s2286_s23 }
 0x448   : > { %p2295_p9 = por %p2294_p0, %p2293_p1 }
 0x44a   : > { %p2296_p12 = pnand %p2295_p9, %p2289_p5 }
 0x44c   : > { %2299 = shalt.err (!%p2296_p12)
}
 0x44d   : > { %s2300_s29 = scalar_lea.hbm %s3323_s20, 2048  ;;  %s2304_s19 = scalar_lea.hbm %s3498_s13, 4096 }
 0x44e   : > { %p2301_p3 = scmp.ne.s32.totalorder %s3323_s20, %s2300_s29  ;;  %p2305_p8 = scmp.lt.u32.totalorder %s3323_s20, %s3498_s13 }
 0x44f   : > { %p2306_p10 = scmp.lt.u32.totalorder %s2304_s19, %s2300_s29  ;;  %p2308_p13 = scmp.lt.u32.totalorder %s2300_s29, %s3323_s20 }
 0x450   : > { %p2302_p4 = pnand %p2301_p3, %p3499_p11 }
 0x451   : > { %p2307_p2 = por %p2306_p10, %p2305_p8 }
 0x452   : > { %p2303_p7 = pneg %p2302_p4 }
 0x453   : > { %p2309_p6 = por %p2308_p13, %p2307_p2 }
 0x455   : > { %p2310_p5 = pnand %p2309_p6, %p2303_p7 }
 0x457   : > { %2313 = shalt.err (!%p2310_p5)
}
 0x458   : > { %s2422_s15 = smov 128   ;;  %s2423_s16 = smov 8  }
 0x459   : > { %1988 = dma.vmem_to_hbm [thread:$0]  (%p3499_p11), %s3326_s12, 2048, %s3323_s20, %s1562_s18, %s2422_s15, %s2422_s15, %s2423_s16  }
 0x45a PF: > { %p2005_p1 = scmp.ge.s32.totalorder %s2412_s11, 2  ;;  %s1590_s30 = sand.u32 1, %s2384_s27  }
 0x45b   : > { %p3500_p0 = scmp.ne.s32.totalorder %s3446_s6, 0  ;;  %s1591_s8 = scalar_lea.sflag [#allocation6], %s1590_s30 }
 0x45d   : > { %p2001_p9 = pnand %p2005_p1, %p3500_p0 }
 0x45f   : > { %2367 = dma.done.wait (!%p2001_p9), %s1591_s8, 2048  }
 0x460   : > { %2369 = vsyncadd (!%p2001_p9), %s1591_s8, 4294965248  ;;  %s26_s11 = sadd.s32 1, %s2412_s11   ;;  %s3501_s1 = sld [smem:[#allocation14_spill]] }
 0x461   : > { %p23_p12 = scmp.ge.s32.totalorder %s26_s11, 6   ;;  %s3502_s26 = sld [smem:[#allocation19_spill]] }
 0x462   : > { %s3503_s21 = sld [smem:[#allocation15_spill]]  ;;  %s3504_s29 = sld [smem:[#allocation21_spill]] }
 0x463   : > { %s3505_s8 = sld [smem:[#allocation17_spill]]  ;;  %s3506_s3 = sld [smem:[#allocation18_spill]] }
 0x464   : > { %s3507_s10 = sld [smem:[#allocation20_spill]]  ;;  %s3508_s24 = smov %s2376_s25 }
 0x465   : > { %s3510_s27 = smov %s2388_s28  ;;  %s3512_s30 = smov %s2404_s9 }
 0x466   : > { %s3509_s25 = smov %s3501_s1  ;;  %25 = sbr.rel (!%p23_p12) target bundleno = 17 (0x11), region = 128 }
 0x468   : > { %s3511_s28 = smov %s3503_s21 }
 0x469   : > { %s3513_s9 = smov %s3506_s3 }
 0x46d   :  { %1596 = vsyncpa [#allocation5], 1 }
 0x46e   :  { %1598 = vsyncpa [#allocation5 + $0x1], 1 }
 0x46f   :  { %1599 = vsyncpa [#allocation8], 1 }
 0x470   :  { %1601 = vsyncpa [#allocation8 + $0x1], 1 }
 0x471   :  { %1602 = vsyncpa [#allocation6], 1 }
 0x472   :  { %1604 = vsyncpa [#allocation6 + $0x1], 1 }

</bundles_post_ra>
